<compile_context>
chip_gen: v6e
topology: v6e:2x2x1
jax: 0.10.0
libtpu: 0.0.40
codegen_flags: <defaults>
</compile_context>

<pallas_src>
import functools

import jax
import jax.numpy as jnp
from jax.experimental import pallas as pl
from jax.experimental.pallas import tpu as pltpu


def _landi_attention_kernel(x_ref, gate_ref, w_qkv_ref, la_ref, lb_ref,
                            wp_ref, bp_ref, o_ref, q_h, k_h, v_h,
                            *, num_heads, head_dim, tq):
    qi = pl.program_id(1)
    N = x_ref.shape[0]
    H, D = num_heads, head_dim
    C = H * D
    cdt = x_ref.dtype                  # MXU operand dtype (bf16 in production)

    # ---- once per batch: fused LoRA-gated QKV + combined head relayout ------
    @pl.when(qi == 0)
    def _():
        x = x_ref[...]                                           # (N, C)
        gate = gate_ref[...]                                     # (1, r) f32
        lora_mid = (jnp.dot(x, la_ref[...],
                            preferred_element_type=jnp.float32) * gate).astype(cdt)
        qkv = jnp.dot(x, w_qkv_ref[...], preferred_element_type=jnp.float32)
        qkv = qkv + jnp.dot(lora_mid, lb_ref[...],
                            preferred_element_type=jnp.float32)
        qkv = qkv.astype(cdt)                                    # (N, 3C)
        # single combined relayout to head-major, cached in VMEM scratch.
        heads = jnp.transpose(qkv.reshape(N, 3 * H, D), (1, 0, 2))   # (3H, N, D)
        q_h[...] = heads[:H]
        k_h[...] = heads[H:2 * H]
        v_h[...] = heads[2 * H:]

    # ---- per q-tile attention (logits resident only at (H, Tq, N)) ----------
    q0 = pl.multiple_of(qi * tq, tq)
    qh = q_h[:, pl.ds(q0, tq), :]                                # (H, Tq, D)
    kh = k_h[...]                                                # (H, N, D)
    vh = v_h[...]

    logits = jnp.einsum('hqd,hkd->hqk', qh, kh,
                        preferred_element_type=jnp.float32)      # (H, Tq, N)
    m = jnp.max(logits, axis=-1, keepdims=True)
    z = logits - m
    if cdt == jnp.bfloat16:
        z = z.astype(jnp.bfloat16)     # bf16 EUP/VALU on v6e/v7x; safe post max-sub
    p = jnp.exp(z)
    denom = jnp.sum(p.astype(jnp.float32), axis=-1, keepdims=True)
    r0 = pl.reciprocal(denom, approx=True)
    rinv = r0 * (2.0 - denom * r0)     # one Newton step -> near-exact reciprocal
    attn = (p * rinv.astype(p.dtype)).astype(cdt)
    ctx_h = jnp.einsum('hqk,hkd->hqd', attn, vh,
                       preferred_element_type=jnp.float32)       # (H, Tq, D)

    # ---- output projection of this tile (lane-dense (Tq,C)@(C,C)) -----------
    o = jnp.transpose(ctx_h, (1, 0, 2)).reshape(tq, C).astype(cdt)
    o = jnp.dot(o, wp_ref[...], preferred_element_type=jnp.float32) + bp_ref[...]
    o_ref[...] = o.astype(o_ref.dtype)


def _pick_q_tile(n, target=256):
    """Largest q-tile <= target dividing n (multiple of 8 if possible)."""
    if n <= target:
        return n
    t = (target // 8) * 8
    while t >= 8:
        if n % t == 0:
            return t
        t -= 8
    return n   # fall back: whole sequence per step


def landi_attention(x, ctx, params, *, num_heads, lora_alpha=1, q_tile=256):
    B, N, C = x.shape
    head_dim = C // num_heads
    r = params["lora_A"].shape[0]
    lora_scaling = lora_alpha / r
    scale = head_dim ** -0.5
    wdt = x.dtype
    tq = _pick_q_tile(N, q_tile)
    num_q_tiles = N // tq

    # ---- host-side layout plumbing: transpose, fuse q|k|v, fold scales ------
    col_scale = jnp.concatenate(
        [jnp.full((C,), scale, jnp.float32), jnp.ones((2 * C,), jnp.float32)])
    w_qkv_t = (params["w_qkv"].T * col_scale).astype(wdt)              # (C, 3C)
    la_t = params["lora_A"].T.astype(wdt)                              # (C, r)
    lb_t = (params["lora_B"].T * (lora_scaling * col_scale)).astype(wdt)  # (r, 3C)
    wp_t = params["w_proj"].T.astype(wdt)                              # (C, C)
    bp = params["b_proj"].reshape(1, C).astype(jnp.float32)            # (1, C)

    # ctx gate: tiny (B, r) matvec -> keep it out of the kernel entirely.
    gate = (ctx @ params["w_ctx"].T + params["b_ctx"]).astype(jnp.float32)
    gate = gate.reshape(B, 1, r)

    kernel = functools.partial(_landi_attention_kernel,
                               num_heads=num_heads, head_dim=head_dim, tq=tq)

    def weight_spec(arr):
        nd = arr.ndim
        # block index never changes across the grid -> single-buffer.
        return pl.BlockSpec(arr.shape, lambda *_args, _n=nd: (0,) * _n,
                            pipeline_mode=pl.Buffered(1))

    # ---- VMEM budget: resident buffers + largest transient temporaries ------
    itemsize = jnp.dtype(wdt).itemsize
    weight_bytes = sum(int(a.size) * a.dtype.itemsize
                       for a in (w_qkv_t, la_t, lb_t, wp_t, bp))   # Buffered(1)
    io_bytes = 2 * (N * C + tq * C) * itemsize + 2 * r * 4         # x, out, gate
    scratch_bytes = 3 * N * C * itemsize                           # q/k/v heads
    proj_tmp = N * 3 * C * 4 + N * r * 8 + 3 * N * C * itemsize    # f32 qkv, mid, relayout
    attn_tmp = num_heads * tq * N * (8 + itemsize) \
        + tq * C * (8 + 2 * itemsize)                              # logits+p+attn, ctx/o
    vmem_needed = (weight_bytes + io_bytes + scratch_bytes + proj_tmp + attn_tmp)
    try:
        vmem_cap = pltpu.get_tpu_info().vmem_capacity_bytes
    except Exception:
        vmem_cap = 64 * 1024 * 1024                                # v7x floor
    vmem_limit = int(min(max(vmem_needed * 1.3, 32 * 1024 * 1024),
                         0.9 * vmem_cap))

    return pl.pallas_call(
        kernel,
        out_shape=jax.ShapeDtypeStruct((B, N, C), x.dtype),
        grid=(B, num_q_tiles),
        in_specs=[
            pl.BlockSpec((pl.Squeezed(), N, C), lambda b, qi: (b, 0, 0)),   # x
            pl.BlockSpec((pl.Squeezed(), 1, r), lambda b, qi: (b, 0, 0)),   # gate
            weight_spec(w_qkv_t), weight_spec(la_t), weight_spec(lb_t),
            weight_spec(wp_t), weight_spec(bp),
        ],
        out_specs=pl.BlockSpec((pl.Squeezed(), tq, C),
                               lambda b, qi: (b, qi, 0)),
        scratch_shapes=[
            pltpu.VMEM((num_heads, N, head_dim), wdt),    # q, head-major
            pltpu.VMEM((num_heads, N, head_dim), wdt),    # k
            pltpu.VMEM((num_heads, N, head_dim), wdt),    # v
        ],
        compiler_params=pltpu.CompilerParams(
            # q-tile axis is 'arbitrary': qi==0 fills the per-batch qkv scratch
            # that later q tiles of the same batch reuse.
            dimension_semantics=("parallel", "arbitrary"),
            vmem_limit_bytes=vmem_limit),
    )(x, gate, w_qkv_t, la_t, lb_t, wp_t, bp)


def landi_attention_ref(x, ctx, params, *, num_heads, lora_alpha=1):
    """Pure-JAX reference mirroring the PyTorch forward (eval mode)."""
    B, N, C = x.shape
    head_dim = C // num_heads
    r = params["lora_A"].shape[0]
    scaling = lora_alpha / r
    scale = head_dim ** -0.5

    gate = ctx @ params["w_ctx"].T + params["b_ctx"]                     # (B, r)
    qkv = x @ params["w_qkv"].T \
        + ((x @ params["lora_A"].T) * gate[:, None, :]) @ params["lora_B"].T * scaling
    qkv = qkv.reshape(B, N, 3, num_heads, head_dim).transpose(2, 0, 3, 1, 4)
    q, k, v = qkv[0], qkv[1], qkv[2]
    q = q * scale
    attn = jax.nn.softmax(q @ jnp.swapaxes(k, -2, -1), axis=-1)
    o = (attn @ v).transpose(0, 2, 1, 3).reshape(B, N, C)
    return o @ params["w_proj"].T + params["b_proj"]


if __name__ == "__main__":
    # Small shapes consistent with the module (forward asserts ctx_dim == dim).
    B, N = 2, 8
    dim = 32            # C
    ctx_dim = dim
    num_heads = 8       # head_dim = 4
    r = 4
    lora_alpha = 1

    key = jax.random.PRNGKey(0)
    keys = jax.random.split(key, 10)

    params = {
        "w_qkv": 0.1 * jax.random.normal(keys[0], (3 * dim, dim), jnp.float32),
        "lora_A": 0.1 * jax.random.normal(keys[1], (r, dim), jnp.float32),
        "lora_B": 0.1 * jax.random.normal(keys[2], (3 * dim, r), jnp.float32),
        "w_ctx": 0.1 * jax.random.normal(keys[3], (r, ctx_dim), jnp.float32),
        "b_ctx": 0.1 * jax.random.normal(keys[4], (1, r), jnp.float32),
        "w_proj": 0.1 * jax.random.normal(keys[5], (dim, dim), jnp.float32),
        "b_proj": 0.1 * jax.random.normal(keys[6], (1, dim), jnp.float32),
    }

    x = jax.random.normal(keys[7], (B, N, dim), jnp.float32)
    ctx = jax.random.normal(keys[8], (B, ctx_dim), jnp.float32)

    out = landi_attention(x, ctx, params, num_heads=num_heads,
                          lora_alpha=lora_alpha)
    out = jax.block_until_ready(out)

    ref = landi_attention_ref(x, ctx, params, num_heads=num_heads,
                              lora_alpha=lora_alpha)
    assert out.shape == (B, N, dim) and out.dtype == jnp.float32
    # Newton-corrected reciprocal is near-exact; remaining diff is MXU f32
    # matmul rounding vs the XLA reference.
    assert jnp.allclose(out, ref, rtol=2e-3, atol=2e-3), \
        f"max abs err {jnp.max(jnp.abs(out - ref))}"

    print("KERNEL_OK")
</pallas_src>

<mosaic_0001>
module attributes {stable_mosaic.version = 11 : i64} {
  func.func @_landi_attention_kernel(%arg0: i32, %arg1: i32, %arg2: memref<1x8x32xf32, #tpu.memory_space<vmem>>, %arg3: memref<1x1x4xf32, #tpu.memory_space<vmem>>, %arg4: memref<32x96xf32, #tpu.memory_space<vmem>>, %arg5: memref<32x4xf32, #tpu.memory_space<vmem>>, %arg6: memref<4x96xf32, #tpu.memory_space<vmem>>, %arg7: memref<32x32xf32, #tpu.memory_space<vmem>>, %arg8: memref<1x32xf32, #tpu.memory_space<vmem>>, %arg9: memref<1x8x32xf32, #tpu.memory_space<vmem>>, %arg10: memref<8x8x4xf32, #tpu.memory_space<vmem>>, %arg11: memref<8x8x4xf32, #tpu.memory_space<vmem>>, %arg12: memref<8x8x4xf32, #tpu.memory_space<vmem>>) attributes {dimension_semantics = [#tpu.dimension_semantics<parallel>, #tpu.dimension_semantics<arbitrary>], iteration_bounds = array<i64: 2, 1>, scalar_prefetch = 0 : i64, scratch_operands = 3 : i64, tpu.core_type = #tpu.core_type<tc>, window_params = [{transform_indices = @transform_0, window_bounds = array<i64: 1, 8, 32>}, {transform_indices = @transform_1, window_bounds = array<i64: 1, 1, 4>}, {pipeline_mode = #tpu.pipeline_mode<synchronous>, transform_indices = @transform_2, window_bounds = array<i64: 32, 96>}, {pipeline_mode = #tpu.pipeline_mode<synchronous>, transform_indices = @transform_3, window_bounds = array<i64: 32, 4>}, {pipeline_mode = #tpu.pipeline_mode<synchronous>, transform_indices = @transform_4, window_bounds = array<i64: 4, 96>}, {pipeline_mode = #tpu.pipeline_mode<synchronous>, transform_indices = @transform_5, window_bounds = array<i64: 32, 32>}, {pipeline_mode = #tpu.pipeline_mode<synchronous>, transform_indices = @transform_6, window_bounds = array<i64: 1, 32>}, {transform_indices = @transform_7, window_bounds = array<i64: 1, 8, 32>}]} {
    %c0_i32 = arith.constant 0 : i32
    %0 = arith.cmpi eq, %arg1, %c0_i32 : i32
    %1 = arith.extui %0 : i1 to i32
    %c0_i32_0 = arith.constant 0 : i32
    %2 = arith.cmpi ne, %1, %c0_i32_0 : i32
    scf.if %2 {
      %c0_20 = arith.constant 0 : index
      %c0_21 = arith.constant 0 : index
      %c0_22 = arith.constant 0 : index
      %35 = vector.load %arg2[%c0_20, %c0_21, %c0_22] : memref<1x8x32xf32, #tpu.memory_space<vmem>>, vector<1x8x32xf32>
      %36 = vector.shape_cast %35 : vector<1x8x32xf32> to vector<8x32xf32>
      %c0_23 = arith.constant 0 : index
      %c0_24 = arith.constant 0 : index
      %c0_25 = arith.constant 0 : index
      %37 = vector.load %arg3[%c0_23, %c0_24, %c0_25] : memref<1x1x4xf32, #tpu.memory_space<vmem>>, vector<1x1x4xf32>
      %38 = vector.shape_cast %37 : vector<1x1x4xf32> to vector<1x4xf32>
      %c0_26 = arith.constant 0 : index
      %c0_27 = arith.constant 0 : index
      %39 = vector.load %arg5[%c0_26, %c0_27] : memref<32x4xf32, #tpu.memory_space<vmem>>, vector<32x4xf32>
      %cst_28 = arith.constant dense<0.000000e+00> : vector<8x4xf32>
      %40 = tpu.matmul %36, %39, %cst_28 {dimension_numbers = #tpu.dot_dimension_numbers<[1], [0], [0], [1], [0, 0, 1, 1], [], []>} : vector<8x32xf32>, vector<32x4xf32>, vector<8x4xf32> -> vector<8x4xf32>
      %41 = vector.broadcast %38 : vector<1x4xf32> to vector<8x4xf32>
      %42 = arith.mulf %40, %41 : vector<8x4xf32>
      %c0_29 = arith.constant 0 : index
      %c0_30 = arith.constant 0 : index
      %43 = vector.load %arg4[%c0_29, %c0_30] : memref<32x96xf32, #tpu.memory_space<vmem>>, vector<32x96xf32>
      %cst_31 = arith.constant dense<0.000000e+00> : vector<8x96xf32>
      %44 = tpu.matmul %36, %43, %cst_31 {dimension_numbers = #tpu.dot_dimension_numbers<[1], [0], [0], [1], [0, 0, 1, 1], [], []>} : vector<8x32xf32>, vector<32x96xf32>, vector<8x96xf32> -> vector<8x96xf32>
      %c0_32 = arith.constant 0 : index
      %c0_33 = arith.constant 0 : index
      %45 = vector.load %arg6[%c0_32, %c0_33] : memref<4x96xf32, #tpu.memory_space<vmem>>, vector<4x96xf32>
      %cst_34 = arith.constant dense<0.000000e+00> : vector<8x96xf32>
      %46 = tpu.matmul %42, %45, %cst_34 {dimension_numbers = #tpu.dot_dimension_numbers<[1], [0], [0], [1], [0, 0, 1, 1], [], []>} : vector<8x4xf32>, vector<4x96xf32>, vector<8x96xf32> -> vector<8x96xf32>
      %47 = arith.addf %44, %46 : vector<8x96xf32>
      %48 = vector.shape_cast %47 : vector<8x96xf32> to vector<8x24x4xf32>
      %49 = tpu.transpose %48, [1, 0, 2] : vector<8x24x4xf32> -> vector<24x8x4xf32>
      %50 = vector.extract_strided_slice %49 {offsets = [0, 0, 0], sizes = [8, 8, 4], strides = [1, 1, 1]} : vector<24x8x4xf32> to vector<8x8x4xf32>
      %c0_35 = arith.constant 0 : index
      %c0_36 = arith.constant 0 : index
      %c0_37 = arith.constant 0 : index
      %51 = vector.load %arg10[%c0_35, %c0_36, %c0_37] : memref<8x8x4xf32, #tpu.memory_space<vmem>>, vector<8x8x4xf32>
      tpu.vector_store %arg10[%c0_35, %c0_36, %c0_37], %50 {strides = array<i32>} : memref<8x8x4xf32, #tpu.memory_space<vmem>>, vector<8x8x4xf32>,
      %52 = vector.extract_strided_slice %49 {offsets = [8, 0, 0], sizes = [8, 8, 4], strides = [1, 1, 1]} : vector<24x8x4xf32> to vector<8x8x4xf32>
      %c0_38 = arith.constant 0 : index
      %c0_39 = arith.constant 0 : index
      %c0_40 = arith.constant 0 : index
      %53 = vector.load %arg11[%c0_38, %c0_39, %c0_40] : memref<8x8x4xf32, #tpu.memory_space<vmem>>, vector<8x8x4xf32>
      tpu.vector_store %arg11[%c0_38, %c0_39, %c0_40], %52 {strides = array<i32>} : memref<8x8x4xf32, #tpu.memory_space<vmem>>, vector<8x8x4xf32>,
      %54 = vector.extract_strided_slice %49 {offsets = [16, 0, 0], sizes = [8, 8, 4], strides = [1, 1, 1]} : vector<24x8x4xf32> to vector<8x8x4xf32>
      %c0_41 = arith.constant 0 : index
      %c0_42 = arith.constant 0 : index
      %c0_43 = arith.constant 0 : index
      %55 = vector.load %arg12[%c0_41, %c0_42, %c0_43] : memref<8x8x4xf32, #tpu.memory_space<vmem>>, vector<8x8x4xf32>
      tpu.vector_store %arg12[%c0_41, %c0_42, %c0_43], %54 {strides = array<i32>} : memref<8x8x4xf32, #tpu.memory_space<vmem>>, vector<8x8x4xf32>,
    } else {
    }
    %c8_i32 = arith.constant 8 : i32
    %3 = arith.muli %arg1, %c8_i32 : i32
    %4 = tpu.assume_multiple %3, 8 : i32
    %c0 = arith.constant 0 : index
    %5 = arith.index_cast %4 : i32 to index
    %c0_1 = arith.constant 0 : index
    %6 = vector.load %arg10[%c0, %5, %c0_1] : memref<8x8x4xf32, #tpu.memory_space<vmem>>, vector<8x8x4xf32>
    %c0_2 = arith.constant 0 : index
    %c0_3 = arith.constant 0 : index
    %c0_4 = arith.constant 0 : index
    %7 = vector.load %arg11[%c0_2, %c0_3, %c0_4] : memref<8x8x4xf32, #tpu.memory_space<vmem>>, vector<8x8x4xf32>
    %c0_5 = arith.constant 0 : index
    %c0_6 = arith.constant 0 : index
    %c0_7 = arith.constant 0 : index
    %8 = vector.load %arg12[%c0_5, %c0_6, %c0_7] : memref<8x8x4xf32, #tpu.memory_space<vmem>>, vector<8x8x4xf32>
    "tpu.trace_start"() <{level = 10 : i32, message = "hqd,hkd->hqk"}> : () -> ()
    %cst = arith.constant dense<0.000000e+00> : vector<8x8x8xf32>
    %9 = tpu.matmul %6, %7, %cst {dimension_numbers = #tpu.dot_dimension_numbers<[2], [2], [1], [1], [0, 0, 0, 1, 1, 1], [0], [0]>} : vector<8x8x4xf32>, vector<8x8x4xf32>, vector<8x8x8xf32> -> vector<8x8x8xf32>
    "tpu.trace_stop"() : () -> ()
    %cst_8 = arith.constant dense<0xFF800000> : vector<8x8xf32>
    %10 = vector.multi_reduction <maximumf>, %9, %cst_8 [2] : vector<8x8x8xf32> to vector<8x8xf32>
    %11 = vector.shape_cast %10 : vector<8x8xf32> to vector<8x8x1xf32>
    %12 = vector.broadcast %11 : vector<8x8x1xf32> to vector<8x8x8xf32>
    %13 = arith.subf %9, %12 : vector<8x8x8xf32>
    %14 = math.exp %13 : vector<8x8x8xf32>
    %cst_9 = arith.constant dense<0.000000e+00> : vector<8x8xf32>
    %15 = vector.multi_reduction <add>, %14, %cst_9 [2] : vector<8x8x8xf32> to vector<8x8xf32>
    %16 = vector.shape_cast %15 : vector<8x8xf32> to vector<8x8x1xf32>
    %17 = tpu.reciprocal %16 {approx = true} : vector<8x8x1xf32> -> vector<8x8x1xf32>
    %18 = arith.mulf %16, %17 : vector<8x8x1xf32>
    %cst_10 = arith.constant 2.000000e+00 : f32
    %19 = vector.broadcast %cst_10 : f32 to vector<8x8x1xf32>
    %20 = arith.subf %19, %18 : vector<8x8x1xf32>
    %21 = arith.mulf %17, %20 : vector<8x8x1xf32>
    %22 = vector.broadcast %21 : vector<8x8x1xf32> to vector<8x8x8xf32>
    %23 = arith.mulf %14, %22 : vector<8x8x8xf32>
    "tpu.trace_start"() <{level = 10 : i32, message = "hqk,hkd->hqd"}> : () -> ()
    %cst_11 = arith.constant dense<0.000000e+00> : vector<8x8x4xf32>
    %24 = tpu.matmul %23, %8, %cst_11 {dimension_numbers = #tpu.dot_dimension_numbers<[2], [1], [1], [2], [0, 0, 0, 1, 1, 2], [0], [0]>} : vector<8x8x8xf32>, vector<8x8x4xf32>, vector<8x8x4xf32> -> vector<8x8x4xf32>
    "tpu.trace_stop"() : () -> ()
    %25 = tpu.transpose %24, [1, 0, 2] : vector<8x8x4xf32> -> vector<8x8x4xf32>
    %26 = vector.shape_cast %25 : vector<8x8x4xf32> to vector<8x32xf32>
    %c0_12 = arith.constant 0 : index
    %c0_13 = arith.constant 0 : index
    %27 = vector.load %arg7[%c0_12, %c0_13] : memref<32x32xf32, #tpu.memory_space<vmem>>, vector<32x32xf32>
    %cst_14 = arith.constant dense<0.000000e+00> : vector<8x32xf32>
    %28 = tpu.matmul %26, %27, %cst_14 {dimension_numbers = #tpu.dot_dimension_numbers<[1], [0], [0], [1], [0, 0, 1, 1], [], []>} : vector<8x32xf32>, vector<32x32xf32>, vector<8x32xf32> -> vector<8x32xf32>
    %c0_15 = arith.constant 0 : index
    %c0_16 = arith.constant 0 : index
    %29 = vector.load %arg8[%c0_15, %c0_16] : memref<1x32xf32, #tpu.memory_space<vmem>>, vector<1x32xf32>
    %30 = vector.broadcast %29 : vector<1x32xf32> to vector<8x32xf32>
    %31 = arith.addf %28, %30 : vector<8x32xf32>
    %c0_17 = arith.constant 0 : index
    %c0_18 = arith.constant 0 : index
    %c0_19 = arith.constant 0 : index
    %32 = vector.load %arg9[%c0_17, %c0_18, %c0_19] : memref<1x8x32xf32, #tpu.memory_space<vmem>>, vector<1x8x32xf32>
    %33 = vector.shape_cast %32 : vector<1x8x32xf32> to vector<8x32xf32>
    %34 = vector.shape_cast %31 : vector<8x32xf32> to vector<1x8x32xf32>
    tpu.vector_store %arg9[%c0_17, %c0_18, %c0_19], %34 {strides = array<i32>} : memref<1x8x32xf32, #tpu.memory_space<vmem>>, vector<1x8x32xf32>,
    return
  }
  func.func @transform_0(%arg0: i32, %arg1: i32) -> (i32, i32, i32) {
    %c0_i32 = arith.constant 0 : i32
    %c0_i32_0 = arith.constant 0 : i32
    %c0_i32_1 = arith.constant 0 : i32
    return %arg0, %c0_i32, %c0_i32_0 : i32, i32, i32
  }
  func.func @transform_1(%arg0: i32, %arg1: i32) -> (i32, i32, i32) {
    %c0_i32 = arith.constant 0 : i32
    %c0_i32_0 = arith.constant 0 : i32
    %c0_i32_1 = arith.constant 0 : i32
    return %arg0, %c0_i32, %c0_i32_0 : i32, i32, i32
  }
  func.func @transform_2(%arg0: i32, %arg1: i32) -> (i32, i32) {
    %c0_i32 = arith.constant 0 : i32
    %c0_i32_0 = arith.constant 0 : i32
    %c0_i32_1 = arith.constant 0 : i32
    return %c0_i32, %c0_i32_0 : i32, i32
  }
  func.func @transform_3(%arg0: i32, %arg1: i32) -> (i32, i32) {
    %c0_i32 = arith.constant 0 : i32
    %c0_i32_0 = arith.constant 0 : i32
    %c0_i32_1 = arith.constant 0 : i32
    return %c0_i32, %c0_i32_0 : i32, i32
  }
  func.func @transform_4(%arg0: i32, %arg1: i32) -> (i32, i32) {
    %c0_i32 = arith.constant 0 : i32
    %c0_i32_0 = arith.constant 0 : i32
    %c0_i32_1 = arith.constant 0 : i32
    return %c0_i32, %c0_i32_0 : i32, i32
  }
  func.func @transform_5(%arg0: i32, %arg1: i32) -> (i32, i32) {
    %c0_i32 = arith.constant 0 : i32
    %c0_i32_0 = arith.constant 0 : i32
    %c0_i32_1 = arith.constant 0 : i32
    return %c0_i32, %c0_i32_0 : i32, i32
  }
  func.func @transform_6(%arg0: i32, %arg1: i32) -> (i32, i32) {
    %c0_i32 = arith.constant 0 : i32
    %c0_i32_0 = arith.constant 0 : i32
    %c0_i32_1 = arith.constant 0 : i32
    return %c0_i32, %c0_i32_0 : i32, i32
  }
  func.func @transform_7(%arg0: i32, %arg1: i32) -> (i32, i32, i32) {
    %c0_i32 = arith.constant 0 : i32
    %c0_i32_0 = arith.constant 0 : i32
    return %arg0, %arg1, %c0_i32 : i32, i32, i32
  }
}

</mosaic_0001>

<bundles_post_ra>
// kernel: tpu_custom_call.1
= control target key start
LH: loop header
LB: loop body
LE: loop exit
PB: predicated region body
PF: predicated region fallthrough
CT: control target
= control target key end

     0   :  { %s4591_s0 = inlined_call_operand.hbm [shape: f32[2,8,32], index: 0, kind: input, shape index: {}]   ;;  %s4592_s1 = inlined_call_operand.hbm [shape: f32[2,1,4], index: 1, kind: input, shape index: {}]   ;;  %s4593_s2 = inlined_call_operand.vmem [shape: f32[32,96], index: 2, kind: input, shape index: {}]   ;;  %s4594_s3 = inlined_call_operand.vmem [shape: f32[32,4], index: 3, kind: input, shape index: {}]   ;;  %s4595_s4 = inlined_call_operand.vmem [shape: f32[4,96], index: 4, kind: input, shape index: {}]   ;;  %s4596_s5 = inlined_call_operand.hbm [shape: f32[32,32], index: 5, kind: input, shape index: {}]   ;;  %s4597_s6 = inlined_call_operand.vmem [shape: f32[1,32], index: 6, kind: input, shape index: {}]   ;;  %s4598_s7 = inlined_call_operand.hbm [shape: f32[2,8,32], index: 7, kind: output, shape index: {}]  }
   0x1   :  { %4604 = sst [smem:[#allocation21_spill]] %s4591_s0 }
   0x2   :  { %4605 = sst [smem:[#allocation22_spill]] %s4596_s5 }
   0x3   :  { %12 = vsyncpa [#allocation6], 0 }
   0x4   :  { %14 = vsyncpa [#allocation6 + $0x1], 0 }
   0x5   :  { %15 = vsyncpa [#allocation9], 0 }
   0x6   :  { %17 = vsyncpa [#allocation9 + $0x1], 0 }
   0x7   :  { %18 = vsyncpa [#allocation7], 0 }
   0x8   :  { %20 = vsyncpa [#allocation7 + $0x1], 0  ;;  %s4009_s24 = smov 0   ;;  %s4011_s25 = smov 0  }
   0x9   :  { %s4013_s26 = smov 0   ;;  %s4015_s27 = smov 0  }
   0xa   :  { %s4017_s28 = smov 0   ;;  %s4019_s29 = smov 0  }
   0xb LB: > { %4606 = sst [smem:[#allocation16_spill]] %s3915_s26  ;;  %s4040_s30 = sadd.s32 4294967295, %s3927_s29   ;;  %s3927_s29 = sphi %s4019_s29, %s26_s29   ;;  %s3923_s28 = sphi %s4017_s28, %s4631_s28   ;;  %s3919_s27 = sphi %s4015_s27, %s4630_s27   ;;  %s3915_s26 = sphi %s4013_s26, %s4629_s26   ;;  %s3911_s25 = sphi %s4011_s25, %s4628_s25   ;;  %s3907_s24 = sphi %s4009_s24, %s4627_s24  }
   0xc   : > { %4607 = sst [smem:[#allocation17_spill]] %s3927_s29  ;;  %s3366_s8 = sadd.s32 4294967294, %s3927_s29  }
   0xd   : > { %p58_p0 = scmp.ne.s32.totalorder %s3911_s25, %s3907_s24  ;;  %p59_p1 = scmp.eq.s32.totalorder %s4040_s30, 0 }
   0xe   : > { %p221_p3 = scmp.eq.s32.totalorder %s3366_s8, 1  ;;  %p3367_p5 = scmp.ge.s32.totalorder %s3927_s29, 1 }
   0xf   : > { %p4049_p4 = por %p59_p1, %p58_p0  ;;  %p228_p7 = scmp.lt.s32.totalorder %s3927_s29, 3 }
  0x10   : > { %p4054_p6 = por %p221_p3, %p58_p0  ;;  %s3929_s12 = smov [#allocation10]  }
  0x11   : > { %p4059_p8 = pnand %p3367_p5, %p228_p7  ;;  %s249_s13 = sshll.u32 %s3929_s12, 4  ;;  %s250_s13 = int_to_ptr.vmem [resolvable:$true] %s249_s13 }
  0x12   : > { %s4609_s10 = scalar_select %p4054_p6, 1, 0 }
  0x13   : > { %p3621_p9 = pneg %p4059_p8  ;;  %p3369_p10 = scmp.ge.s32.totalorder %s3927_s29, 2 }
  0x14   : > { %4610 = sst [smem:[#allocation18_spill]] %s4609_s10  ;;  %s38_s15 = sadd.s32 1, %s3923_s28 }
  0x15   : > { %p4068_p11 = pnand %p3621_p9, %p59_p1  ;;  %s3768_s16 = scalar_lea.vmem %s250_s13, 512 }
  0x16   : > { %p3769_p13 = scmp.ne.s32.totalorder %s250_s13, %s3768_s16  ;;  %p3776_p5 = scmp.lt.s32.totalorder %s250_s13, %s250_s13 }
  0x17   : > { %p3759_p12 = pneg %p4068_p11  ;;  %p3777_p7 = scmp.lt.s32.totalorder %s3768_s16, %s3768_s16 }
  0x19   : > { %p3771_p0 = pnand %p3769_p13, %p3759_p12  ;;  %p3778_p2 = por %p3777_p7, %p3776_p5 }
  0x1b   : > { %p3772_p3 = pneg %p3771_p0 }
  0x1d   : > { %p3779_p6 = pnand %p3778_p2, %p3772_p3 }
  0x1f   : > { %3782 = shalt.err (!%p3779_p6)
}
  0x20   : > { %s3930_s17 = smov 128   ;;  %s3931_s18 = smov 8  }
  0x21   : > { %s4613_s5 = sld [smem:[#allocation22_spill]]  ;;  %p40_p2 = scmp.ge.s32.totalorder %s38_s15, 2 }
  0x22   : > { %s45_s21 = sadd.s32 1, %s3915_s26  ;;  %p52_p6 = scmp.ne.s32.totalorder %s3915_s26, %s3911_s25 }
  0x23   : > { %p53_p9 = scmp.eq.s32.totalorder %s3927_s29, 0  ;;  %s4633_s15 = smov (%p40_p2, %s38_s15), 0 }
  0x24   : > { %4614 = sst [smem:[#allocation19_spill]] %s4633_s15  ;;  %p4616_p13 = scmp.eq.s32.totalorder %s4040_s30, 1 }
  0x25   : > { %p4086_p12 = por %p53_p9, %p52_p6  ;;  %s42_s8 = ssub.s32 %s3923_s28, %s4633_s15 }
  0x26   : > { %p4092_p0 = por %p4616_p13, %p52_p6  ;;  %p43_p3 = scmp.eq.s32.totalorder %s42_s8, 0 }
  0x27   : > { %3624 = dma.hbm_to_vmem [thread:$0]  (!%p4068_p11), %s4613_s5, 512, %s250_s13, [#allocation9], %s3930_s17, %s3930_s17, %s3931_s18  }
  0x28   : > { %p3637_p11 = scmp.lt.s32.totalorder %s3927_s29, 2  ;;  %s266_s12 = sand.u32 1, %s3915_s26  }
  0x29   : > { %s3370_s13 = sshll.u32 %s266_s12, 3  ;;  %s3371_s16 = sshll.u32 %s3923_s28, 7 }
  0x2a   : > { %s4101_s14 = scalar_select %p43_p3, %s3915_s26, %s45_s21  }
  0x2b   : > { %s4619_s0 = sld [smem:[#allocation21_spill]]  ;;  %s270_s20 = scalar_lea.vmem [#allocation5], %s3370_s13 }
  0x2c   : > { %4618 = sst [smem:[#allocation20_spill]] %s4101_s14  ;;  %s277_s5 = sshll.u32 %s270_s20, 4  ;;  %s278_s5 = int_to_ptr.vmem [resolvable:$true] %s277_s5 }
  0x2d   : > { %p4109_p5 = pnand %p3637_p11, %p4086_p12  ;;  %s284_s8 = sand.u32 1, %s3927_s29  }
  0x2e   : > { %s267_s15 = scalar_lea.sflag [#allocation6], %s266_s12  ;;  %s3796_s21 = scalar_lea.vmem %s278_s5, 128 }
  0x2f   : > { %p3785_p7 = pneg %p4109_p5  ;;  %p3797_p2 = scmp.ne.s32.totalorder %s278_s5, %s3796_s21 }
  0x30   : > { %s3932_s13 = smov [#allocation5]  }
  0x31   : > { %s275_s19 = scalar_lea.hbm %s4619_s0, %s3371_s16  ;;  %p3799_p6 = pnand %p3797_p2, %p3785_p7 }
  0x32   : > { %s3801_s16 = sshll.u32 %s3932_s13, 4  ;;  %s3802_s16 = int_to_ptr.vmem [resolvable:$false] %s3801_s16 }
  0x33   : > { %p3800_p9 = pneg %p3799_p6  ;;  %s3803_s22 = scalar_lea.vmem %s3802_s16, 256 }
  0x34   : > { %p3804_p12 = scmp.lt.s32.totalorder %s278_s5, %s3802_s16  ;;  %p3805_p13 = scmp.lt.s32.totalorder %s3803_s22, %s3796_s21 }
  0x36   : > { %p3806_p11 = por %p3805_p13, %p3804_p12 }
  0x38   : > { %p3807_p3 = pnand %p3806_p11, %p3800_p9 }
  0x3a   : > { %3810 = shalt.err (!%p3807_p3)
}
  0x3b   : > { %3628 = dma.hbm_to_vmem [thread:$0]  (!%p4109_p5), %s275_s19, 128, %s278_s5, %s267_s15  }
  0x3c   : > { %s3372_s17 = sshll.u32 %s3923_s28, 4  ;;  %s287_s18 = scalar_lea.vmem [#allocation8], %s266_s12 }
  0x3d   : > { %s294_s20 = sshll.u32 %s287_s18, 4  ;;  %s292_s26 = scalar_lea.hbm %s4592_s1, %s3372_s17  ;;  %s295_s20 = int_to_ptr.vmem [resolvable:$true] %s294_s20 }
  0x3e   : > { %s285_s13 = scalar_lea.sflag [#allocation9], %s284_s8  ;;  %s3824_s29 = scalar_lea.vmem %s295_s20, 16 }
  0x3f   : > { %p3825_p2 = scmp.ne.s32.totalorder %s295_s20, %s3824_s29  ;;  %s3933_s21 = smov [#allocation8]  }
  0x40   : > { %s3829_s16 = sshll.u32 %s3933_s21, 4  ;;  %s3830_s16 = int_to_ptr.vmem [resolvable:$false] %s3829_s16 }
  0x41   : > { %p3827_p6 = pnand %p3825_p2, %p3785_p7  ;;  %s3831_s22 = scalar_lea.vmem %s3830_s16, 32 }
  0x42   : > { %p3832_p12 = scmp.lt.s32.totalorder %s295_s20, %s3830_s16  ;;  %p3833_p13 = scmp.lt.s32.totalorder %s3831_s22, %s3824_s29 }
  0x43   : > { %p3828_p9 = pneg %p3827_p6 }
  0x44   : > { %p3834_p11 = por %p3833_p13, %p3832_p12 }
  0x46   : > { %p3835_p3 = pnand %p3834_p11, %p3828_p9 }
  0x48   : > { %3838 = shalt.err (!%p3835_p3)
}
  0x49   : > { %3631 = dma.hbm_to_vmem [thread:$0]  (!%p4109_p5), %s292_s26, 16, %s295_s20, %s285_s13  }
  0x4a   : > { %303 = sbr.rel (%p4059_p8) target bundleno = 1741 (0x6cd), region = 48  ;;  %s4133_s0 = sand.u32 (!%p4059_p8), 1, %s3911_s25  }
  0x4b   : > { %s3374_s5 = sshll.u32 (!%p4059_p8), %s4133_s0, 3  ;;  %s306_s15 = scalar_lea.sflag (!%p4059_p8), [#allocation6], %s4133_s0 }
  0x4c   : > { %s309_s29 = scalar_lea.vmem (!%p4059_p8), [#allocation5], %s3374_s5 }
  0x4f   : > { %3890 = dma.done.wait (%p4049_p4), %s306_s15, 128  }
  0x50   : > { %3892 = vsyncadd (%p4049_p4), %s306_s15, 4294967168  ;;  %s314_s26 = sand.u32 1, %s4040_s30   ;;  %s317_s11 = scalar_lea.vmem [#allocation8], %s4133_s0 }
  0x51   : > { %s315_s10 = scalar_lea.sflag [#allocation9], %s314_s26 }
  0x52   : > { %3894 = dma.done.wait (%p4049_p4), %s315_s10, 16  }
  0x53   : > { %3896 = vsyncadd (%p4049_p4), %s315_s10, 4294967280 }
  0x54   : > { %3898 = dma.done.wait (%p59_p1), [#allocation9], 512  }
  0x55   : > { %3900 = vsyncadd (%p59_p1), [#allocation9], 4294966784  ;;  %v3934_v0 = vmov 0.0   ;;  %vm3935_vm0 = vmmov 0   ;;  %v365_v1 = vld [vmem:[%s4594_s3 + $0x18] sm:$0xff]  ;;  %v364_v2 = vld [vmem:[%s4594_s3 + $0x10] sm:$0xff]  ;;  %v675_v22 = vlaneseq }
  0x56   : > { %3493 = vmatprep.subr.mxu0 %v3934_v0  ;;  %3501 = vmatprep.mubr.msk.f32.mxu0 %vm3935_vm0, %v3934_v0  ;;  %v363_v3 = vld [vmem:[%s4594_s3 + $0x8] sm:$0xff]  ;;  %v362_v4 = vld [vmem:[%s4594_s3] sm:$0xff]  ;;  %vm366_vm1 = vcmask 261120   ;;  %vm456_vm2 = vcmask 1043456   ;;  %vm452_vm3 = vcmask 31744   ;;  %v450_v10 = vld [vmem:[%s4593_s2 + $0x18] sm:$0xff] }
  0x57   : > { %3504 = vmatprep.subr.mxu1 %v3934_v0  ;;  %3506 = vmatprep.mubr.msk.f32.mxu1 %vm3935_vm0, %v3934_v0  ;;  %v360_v5 = vld [vmem:[%s309_s29] sm:$0xff]  ;;  %v449_v12 = vld [vmem:[%s4593_s2 + $0x10] sm:$0xff]  ;;  %s3936_s9 = smov 88   ;;  %s3937_s12 = smov 96   ;;  %v3955_v20 = vmov 1983009808  }
  0x58   : > { %3494 = vmatpush3.msra.mxu0 %v365_v1  ;;  %v451_v6 = vld [vmem:[%s4595_s4] sm:$0xf]  ;;  %v448_v13 = vld [vmem:[%s4593_s2 + $0x8] sm:$0xff]  ;;  %s3938_s14 = smov 84   ;;  %s3939_s19 = smov 92   ;;  %v673_v21 = vunpack.c.l.s4 %v3955_v20  ;;  %v676_v26 = vshrl.u32 %v675_v22, 7 }
  0x59   : > { %3495 = vmatprep.subr.mxu0 %v3934_v0  ;;  %3505 = vmatpush3.msk.msra.mxu1 %vm456_vm2, %v451_v6  ;;  %v3378_v7 = vld [vmem:[%s317_s11] ss:$0 sm:$0xff]  ;;  %s3940_s30 = smov 120   ;;  %s3941_s8 = smov 124   ;;  %v3956_v23 = vmov 1934713408  }
  0x5a   : > { %3496 = vmatpush3.msra.mxu0 %v364_v2  ;;  %3509 = vmatprep.subr.mxu1 %v3934_v0  ;;  %v447_v14 = vld [vmem:[%s4593_s2] sm:$0xff]  ;;  %s3942_s17 = smov 80   ;;  %s3943_s18 = smov 116   ;;  %v737_v24 = vunpack.c.l.s4 %v3956_v23  ;;  %v674_v25 = vunpack.c.0.s8 %v673_v21  ;;  %vm2145_vm4 = vcmask 64512   ;;  %vm3144_vm5 = vcmask 97280  }
  0x5b   : > { %3497 = vmatprep.subr.mxu0 %v3934_v0  ;;  %s3944_s20 = smov 72   ;;  %s3945_s13 = smov 76   ;;  %vm3146_vm6 = vcmask 130048   ;;  %vm3148_vm7 = vcmask 162816   ;;  %vm3150_vm8 = vcmask 195584   ;;  %vm3152_vm9 = vcmask 228352  }
  0x5c   : > { %3498 = vmatpush3.msra.mxu0 %v363_v3  ;;  %s3946_s21 = smov 112   ;;  %s3947_s16 = smov 68   ;;  %v738_v29 = vunpack.c.0.s8 %v737_v24  ;;  %v4227_v30 = vsub.s32 %v674_v25, %v676_v26 }
  0x5d   : > { %3499 = vmatprep.subr.mxu0 %v3934_v0  ;;  %s3948_s22 = smov 104   ;;  %s3949_s15 = smov 108  }
  0x5e   : > { %3500 = vmatpush3.msra.mxu0 %v362_v4  ;;  %s3950_s29 = smov 60   ;;  %s3951_s26 = smov 100   ;;  %v4229_v37 = vsub.s32 %v738_v29, %v676_v26 }
  0x5f   : > { %3502 = vmatmul.mubr.msk.f32.vlgmr.msra.gmra.mxu0 %vm366_vm1, %v360_v5  ;;  %3530 = vmatprep.subr.mxu0 %v3934_v0  ;;  %s3952_s10 = smov 56   ;;  %s3953_s11 = smov 64  }
  0x60   : > { %3532 = vmatprep.mubr.msk.f32.mxu0 %vm3935_vm0, %v3934_v0 }
 0x11f   : > { %v436_v8 = vpop.f32.mrf.mxu0 }
 0x120   : > { %v446_v9 = vmul.f32 %v3378_v7, %v436_v8 }
 0x121   : > { %v3503_v11 = vpop.f32.mrf.mxu0 }
 0x122   : > { %3507 = vmatmul.mubr.msk.f32.vlgmr.msra.gmra.mxu1 %vm452_vm3, %v446_v9 }
 0x123   : > { %3510 = vmatpush3.msra.mxu1 %v450_v10  ;;  %3517 = vmatprep.mubr.msk.f32.mxu1 %vm3935_vm0, %v3934_v0 }
 0x124   : > { %3511 = vmatprep.subr.mxu1 %v3934_v0 }
 0x125   : > { %3512 = vmatpush3.msra.mxu1 %v449_v12 }
 0x126   : > { %3513 = vmatprep.subr.mxu1 %v3934_v0 }
 0x127   : > { %3514 = vmatpush3.msra.mxu1 %v448_v13 }
 0x128   : > { %3515 = vmatprep.subr.mxu1 %v3934_v0 }
 0x129   : > { %3516 = vmatpush3.msra.mxu1 %v447_v14 }
 0x12a   : > { %3518 = vmatmul.mubr.msk.f32.vlgmr.msra.gmra.mxu1 %vm366_vm1, %v360_v5  ;;  %3520 = vmatprep.subr.mxu1 %v3934_v0 }
 0x12b   : > { %3522 = vmatprep.mubr.msk.f32.mxu1 %vm3935_vm0, %v3934_v0 }
 0x1e2   : > { %v526_v15 = vpop.f32.mrf.mxu1 }
 0x1e4   : > { %v3508_v16 = vpop.f32.mrf.mxu1 }
 0x1ea   : > { %v596_v17 = vpop.f32.mrf.mxu1 }
 0x1eb   : > { %v4206_v18 = vadd.f32 %v596_v17, %v526_v15 }
 0x1ec   : > { %v3519_v19 = vpop.f32.mrf.mxu1 }
 0x1ed   : > { %628 = vrot.lane.b32.xlu1 %v4206_v18, %s3936_s9  ;;  %622 = vrot.lane.b32.xlu0 %v4206_v18, %s3937_s12  ;;  %s3954_s9 = smov 52   ;;  %s3957_s12 = smov 44  }
 0x1f1   : > { %631 = vrot.lane.b32.xlu1 %v4206_v18, %s3938_s14  ;;  %625 = vrot.lane.b32.xlu0 %v4206_v18, %s3939_s19  ;;  %s3958_s14 = smov 48   ;;  %s3959_s19 = smov 40  }
 0x1f5   : > { %604 = vrot.lane.b32.xlu1 %v4206_v18, %s3940_s30  ;;  %601 = vrot.lane.b32.xlu0 %v4206_v18, %s3941_s8  ;;  %s3960_s30 = smov 36   ;;  %s3961_s8 = smov 8  }
 0x1f9   : > { %634 = vrot.lane.b32.xlu1 %v4206_v18, %s3942_s17  ;;  %607 = vrot.lane.b32.xlu0 %v4206_v18, %s3943_s18  ;;  %s3962_s17 = smov 4   ;;  %s3963_s18 = smov 12  }
 0x1fd   : > { %640 = vrot.lane.b32.xlu1 %v4206_v18, %s3944_s20  ;;  %637 = vrot.lane.b32.xlu0 %v4206_v18, %s3945_s13  ;;  %s3964_s20 = smov 20   ;;  %s3965_s13 = smov 16  }
 0x201   : > { %610 = vrot.lane.b32.xlu1 %v4206_v18, %s3946_s21  ;;  %643 = vrot.lane.b32.xlu0 %v4206_v18, %s3947_s16  ;;  %s3966_s21 = smov 28   ;;  %s3967_s16 = smov 24  }
 0x205   : > { %616 = vrot.lane.b32.xlu1 %v4206_v18, %s3948_s22  ;;  %613 = vrot.lane.b32.xlu0 %v4206_v18, %s3949_s15 }
 0x209   : > { %649 = vrot.lane.b32.xlu1 %v4206_v18, %s3950_s29  ;;  %619 = vrot.lane.b32.xlu0 %v4206_v18, %s3951_s26  ;;  %s3441_s29 = sshll.u32 %s3919_s27, 7  ;;  %s355_s26 = scalar_lea.vmem [#allocation11], %s3374_s5 }
 0x20a   : > { %s3968_s27 = smov [#allocation11]  }
 0x20b   : > { %s3843_s5 = sshll.u32 %s3968_s27, 4  ;;  %s3844_s5 = int_to_ptr.vmem [resolvable:$false] %s3843_s5 }
 0x20d   : > { %652 = vrot.lane.b32.xlu1 %v4206_v18, %s3952_s10  ;;  %646 = vrot.lane.b32.xlu0 %v4206_v18, %s3953_s11  ;;  %s3255_s10 = sshll.u32 %s355_s26, 4  ;;  %s3256_s10 = int_to_ptr.vmem [resolvable:$true] %s3255_s10 }
 0x20e   : > { %p3846_p5 = scmp.lt.s32.totalorder %s3256_s10, %s3844_s5 }
 0x211   : > { %655 = vrot.lane.b32.xlu0 %v4206_v18, %s3954_s9 }
 0x25f   : > { %v629_v27 = vpop.permute.xlu1 %628  ;;  %v623_v28 = vpop.permute.xlu0 %622 }
 0x260   : > { %v806_v31 = vcombine.low %v623_v28, %v629_v27  ;;  %v807_v32 = vcombine.high %v623_v28, %v629_v27 }
 0x262   : > { %v814_v38 = vrot.slane %v806_v31, %v4227_v30  ;;  %v821_v39 = vrot.slane %v807_v32, %v4227_v30 }
 0x263   : > { %v632_v33 = vpop.permute.xlu1 %631  ;;  %v626_v34 = vpop.permute.xlu0 %625 }
 0x264   : > { %v822_v35 = vcombine.low %v626_v34, %v632_v33  ;;  %v823_v36 = vcombine.high %v626_v34, %v632_v33 }
 0x266   : > { %v830_v40 = vrot.slane %v822_v35, %v4227_v30  ;;  %v837_v41 = vrot.slane %v823_v36, %v4227_v30 }
 0x267   : > { %v605_v42 = vpop.permute.xlu1 %604  ;;  %v602_v43 = vpop.permute.xlu0 %601 }
 0x268   : > { %v870_v44 = vcombine.low %v814_v38, %v830_v40  ;;  %v871_v45 = vcombine.high %v814_v38, %v830_v40  ;;  %v886_v46 = vcombine.low %v821_v39, %v837_v41  ;;  %v887_v47 = vcombine.high %v821_v39, %v837_v41 }
 0x269   : > { %v670_v52 = vcombine.low %v4206_v18, %v605_v42  ;;  %v671_v53 = vcombine.high %v4206_v18, %v605_v42 }
 0x26a   : > { %v878_v48 = vrot.slane %v870_v44, %v4229_v37  ;;  %v885_v49 = vrot.slane %v871_v45, %v4229_v37  ;;  %v894_v50 = vrot.slane %v886_v46, %v4229_v37  ;;  %v901_v51 = vrot.slane %v887_v47, %v4229_v37 }
 0x26b   : > { %v635_v54 = vpop.permute.xlu1 %634  ;;  %v608_v55 = vpop.permute.xlu0 %607  ;;  %v678_v3 = vrot.slane %v670_v52, %v4227_v30  ;;  %v685_v4 = vrot.slane %v671_v53, %v4227_v30 }
 0x26c   : > { %v3390_v56 = vcombine.low %v878_v48, %v885_v49  ;;  %v3392_v57 = vcombine.high %v878_v48, %v885_v49  ;;  %v3394_v58 = vcombine.low %v894_v50, %v901_v51  ;;  %v3396_v59 = vcombine.high %v894_v50, %v901_v51 }
 0x26d   : > { %v686_v60 = vcombine.low %v602_v43, %v608_v55  ;;  %v687_v61 = vcombine.high %v602_v43, %v608_v55 }
 0x26e   : > { %v1222_v62 = vrot.slane %v3390_v56, %v4227_v30  ;;  %v1238_v63 = vrot.slane %v3392_v57, %v4227_v30  ;;  %v1254_v1 = vrot.slane %v3394_v58, %v4227_v30  ;;  %v1270_v2 = vrot.slane %v3396_v59, %v4227_v30 }
 0x26f   : > { %v694_v5 = vrot.slane %v686_v60, %v4227_v30  ;;  %v701_v6 = vrot.slane %v687_v61, %v4227_v30  ;;  %v641_v7 = vpop.permute.xlu1 %640  ;;  %v638_v8 = vpop.permute.xlu0 %637 }
 0x270   : > { %v1278_v9 = vcombine.low %v1222_v62, %v1238_v63  ;;  %v1279_v10 = vcombine.high %v1222_v62, %v1238_v63  ;;  %v1310_v11 = vcombine.low %v1254_v1, %v1270_v2  ;;  %v1311_v12 = vcombine.high %v1254_v1, %v1270_v2 }
 0x271   : > { %v734_v13 = vcombine.low %v678_v3, %v694_v5  ;;  %v735_v14 = vcombine.high %v678_v3, %v694_v5  ;;  %v750_v15 = vcombine.low %v685_v4, %v701_v6  ;;  %v751_v16 = vcombine.high %v685_v4, %v701_v6 }
 0x272   : > { %v1286_v17 = vrot.slane %v1278_v9, %v4229_v37  ;;  %v1293_v19 = vrot.slane %v1279_v10, %v4229_v37  ;;  %v1318_v20 = vrot.slane %v1310_v11, %v4229_v37  ;;  %v1325_v21 = vrot.slane %v1311_v12, %v4229_v37 }
 0x273   : > { %v742_v22 = vrot.slane %v734_v13, %v4229_v37  ;;  %v749_v23 = vrot.slane %v735_v14, %v4229_v37  ;;  %v758_v24 = vrot.slane %v750_v15, %v4229_v37  ;;  %v765_v25 = vrot.slane %v751_v16, %v4229_v37  ;;  %v4257_v26 = vpop.permute.xlu1 %610  ;;  %v644_v27 = vpop.permute.xlu0 %643 }
 0x274   : > { %v1342_v28 = vcombine.low %v1286_v17, %v1318_v20  ;;  %v1343_v29 = vcombine.high %v1286_v17, %v1318_v20  ;;  %v1344_v31 = vcombine.low %v1293_v19, %v1325_v21  ;;  %v1345_v32 = vcombine.high %v1293_v19, %v1325_v21 }
 0x275   : > { %v3382_v33 = vcombine.low %v742_v22, %v749_v23  ;;  %v3384_v34 = vcombine.high %v742_v22, %v749_v23  ;;  %v3386_v35 = vcombine.low %v758_v24, %v765_v25  ;;  %v3388_v36 = vcombine.high %v758_v24, %v765_v25 }
 0x276   : > { %1494 = vst.msk [vmem:[#allocation3] sm:$0xff] %vm452_vm3, %v1342_v28  ;;  %1495 = vst.msk [vmem:[#allocation3 + $0x8] sm:$0xff] %vm452_vm3, %v1343_v29  ;;  %v838_v38 = vcombine.low %v635_v54, %v641_v7  ;;  %v839_v39 = vcombine.high %v635_v54, %v641_v7  ;;  %v854_v40 = vcombine.low %v638_v8, %v644_v27 }
 0x277   : > { %1496 = vst.msk [vmem:[#allocation3 + $0x10] sm:$0xff] %vm452_vm3, %v1344_v31  ;;  %1497 = vst.msk [vmem:[#allocation3 + $0x18] sm:$0xff] %vm452_vm3, %v1345_v32  ;;  %v855_v41 = vcombine.high %v638_v8, %v644_v27  ;;  %v1086_v42 = vrot.slane %v3382_v33, %v4227_v30  ;;  %v1102_v43 = vrot.slane %v3384_v34, %v4227_v30  ;;  %v614_v46 = vpop.permute.xlu0 %613  ;;  %v617_v55 = vpop.permute.xlu1 %616 }
 0x278   : > { %v1118_v44 = vrot.slane %v3386_v35, %v4227_v30  ;;  %v1134_v45 = vrot.slane %v3388_v36, %v4227_v30  ;;  %v846_v47 = vrot.slane %v838_v38, %v4227_v30  ;;  %v853_v48 = vrot.slane %v839_v39, %v4227_v30 }
 0x279   : > { %v862_v49 = vrot.slane %v854_v40, %v4227_v30  ;;  %v869_v50 = vrot.slane %v855_v41, %v4227_v30  ;;  %v1142_v51 = vcombine.low %v1086_v42, %v1102_v43  ;;  %v1143_v52 = vcombine.high %v1086_v42, %v1102_v43 }
 0x27a   : > { %v1174_v53 = vcombine.low %v1118_v44, %v1134_v45  ;;  %v1175_v54 = vcombine.high %v1118_v44, %v1134_v45  ;;  %v702_v16 = vcombine.low %v4257_v26, %v617_v55  ;;  %v703_v17 = vcombine.high %v4257_v26, %v617_v55 }
 0x27b   : > { %v902_v56 = vcombine.low %v846_v47, %v862_v49  ;;  %v903_v57 = vcombine.high %v846_v47, %v862_v49  ;;  %v918_v58 = vcombine.low %v853_v48, %v869_v50  ;;  %v919_v59 = vcombine.high %v853_v48, %v869_v50  ;;  %v620_v1 = vpop.permute.xlu0 %619  ;;  %v4286_v19 = vpop.permute.xlu1 %649 }
 0x27c   : > { %v1150_v60 = vrot.slane %v1142_v51, %v4229_v37  ;;  %v1157_v61 = vrot.slane %v1143_v52, %v4229_v37  ;;  %v1182_v62 = vrot.slane %v1174_v53, %v4229_v37  ;;  %v1189_v63 = vrot.slane %v1175_v54, %v4229_v37 }
 0x27d   : > { %v910_v2 = vrot.slane %v902_v56, %v4229_v37  ;;  %v917_v3 = vrot.slane %v903_v57, %v4229_v37  ;;  %v926_v4 = vrot.slane %v918_v58, %v4229_v37  ;;  %v933_v5 = vrot.slane %v919_v59, %v4229_v37  ;;  %v1520_v10 = vld [vmem:[#allocation3] sm:$0xff] }
 0x27e   : > { %v1206_v6 = vcombine.low %v1150_v60, %v1182_v62  ;;  %v1207_v7 = vcombine.high %v1150_v60, %v1182_v62  ;;  %v1208_v8 = vcombine.low %v1157_v61, %v1189_v63  ;;  %v1209_v9 = vcombine.high %v1157_v61, %v1189_v63  ;;  %v1522_v11 = vld [vmem:[#allocation3 + $0x10] sm:$0xff]  ;;  %3521 = vmatpush3.xpose.msk.msra.mxu1 %vm452_vm3, %v1520_v10  ;;  %v1521_v61 = vld [vmem:[#allocation3 + $0x8] sm:$0xff] }
 0x27f   : > { %v3391_v12 = vcombine.low %v910_v2, %v917_v3  ;;  %v3393_v13 = vcombine.high %v910_v2, %v917_v3  ;;  %v3395_v14 = vcombine.low %v926_v4, %v933_v5  ;;  %v3397_v15 = vcombine.high %v926_v4, %v933_v5  ;;  %3531 = vmatpush3.xpose.msk.msra.mxu0 %vm452_vm3, %v1522_v11  ;;  %v647_v22 = vpop.permute.xlu0 %646  ;;  %v653_v49 = vpop.permute.xlu1 %652 }
 0x280   : > { %1486 = vst.msk [vmem:[#allocation2] sm:$0xff] %vm452_vm3, %v1206_v6  ;;  %1487 = vst.msk [vmem:[#allocation2 + $0x8] sm:$0xff] %vm452_vm3, %v1207_v7  ;;  %v718_v20 = vcombine.low %v614_v46, %v620_v1  ;;  %v719_v21 = vcombine.high %v614_v46, %v620_v1  ;;  %3525 = vmatprep.subr.mxu1 %v3934_v0  ;;  %v710_v28 = vrot.slane %v702_v16, %v4227_v30 }
 0x281   : > { %1488 = vst.msk [vmem:[#allocation2 + $0x10] sm:$0xff] %vm452_vm3, %v1208_v8  ;;  %1489 = vst.msk [vmem:[#allocation2 + $0x18] sm:$0xff] %vm452_vm3, %v1209_v9  ;;  %v1229_v23 = vrot.slane %v3391_v12, %v4227_v30  ;;  %v1245_v24 = vrot.slane %v3393_v13, %v4227_v30  ;;  %v1261_v25 = vrot.slane %v3395_v14, %v4227_v30  ;;  %3540 = vmatprep.subr.mxu0 %v3934_v0 }
 0x282   : > { %v1277_v27 = vrot.slane %v3397_v15, %v4227_v30  ;;  %v717_v26 = vrot.slane %v703_v17, %v4227_v30  ;;  %v726_v29 = vrot.slane %v718_v20, %v4227_v30  ;;  %v733_v31 = vrot.slane %v719_v21, %v4227_v30  ;;  %v1523_v21 = vld [vmem:[#allocation3 + $0x18] sm:$0xff] }
 0x283   : > { %v1294_v32 = vcombine.low %v1229_v23, %v1245_v24  ;;  %v1295_v33 = vcombine.high %v1229_v23, %v1245_v24  ;;  %v656_v50 = vpop.permute.xlu0 %655  ;;  %v942_v62 = vcombine.low %v647_v22, %v653_v49  ;;  %v943_v63 = vcombine.high %v647_v22, %v653_v49 }
 0x284   : > { %v1326_v34 = vcombine.low %v1261_v25, %v1277_v27  ;;  %v1327_v35 = vcombine.high %v1261_v25, %v1277_v27  ;;  %v766_v36 = vcombine.low %v710_v28, %v726_v29  ;;  %v767_v38 = vcombine.high %v710_v28, %v726_v29 }
 0x285   : > { %v782_v39 = vcombine.low %v717_v26, %v733_v31  ;;  %v783_v40 = vcombine.high %v717_v26, %v733_v31  ;;  %v1302_v41 = vrot.slane %v1294_v32, %v4229_v37  ;;  %v1309_v42 = vrot.slane %v1295_v33, %v4229_v37 }
 0x286   : > { %v1334_v43 = vrot.slane %v1326_v34, %v4229_v37  ;;  %v1341_v44 = vrot.slane %v1327_v35, %v4229_v37  ;;  %v774_v45 = vrot.slane %v766_v36, %v4229_v37  ;;  %v781_v46 = vrot.slane %v767_v38, %v4229_v37 }
 0x287   : > { %v790_v47 = vrot.slane %v782_v39, %v4229_v37  ;;  %v797_v48 = vrot.slane %v783_v40, %v4229_v37  ;;  %v1512_v55 = vld [vmem:[#allocation2] sm:$0xff]  ;;  %v958_v1 = vcombine.low %v4286_v19, %v656_v50  ;;  %v959_v2 = vcombine.high %v4286_v19, %v656_v50  ;;  %v1513_v15 = vld [vmem:[#allocation2 + $0x8] sm:$0xff] }
 0x288   : > { %v1346_v51 = vcombine.low %v1302_v41, %v1334_v43  ;;  %v1347_v52 = vcombine.high %v1302_v41, %v1334_v43  ;;  %v1348_v53 = vcombine.low %v1309_v42, %v1341_v44  ;;  %v1349_v54 = vcombine.high %v1309_v42, %v1341_v44  ;;  %v1514_v56 = vld [vmem:[#allocation2 + $0x10] sm:$0xff]  ;;  %3523 = vmatmul.mubr.msk.f32.vlgmr.msra.gmra.mxu1 %vm452_vm3, %v1512_v55  ;;  %v1515_v35 = vld [vmem:[#allocation2 + $0x18] sm:$0xff] }
 0x289   : > { %v3383_v57 = vcombine.low %v774_v45, %v781_v46  ;;  %v3385_v58 = vcombine.high %v774_v45, %v781_v46  ;;  %v3387_v59 = vcombine.low %v790_v47, %v797_v48  ;;  %v3389_v60 = vcombine.high %v790_v47, %v797_v48  ;;  %3526 = vmatpush3.xpose.msk.msra.mxu1 %vm452_vm3, %v1521_v61 }
 0x28a   : > { %1498 = vst.msk [vmem:[#allocation3 + $0x20] sm:$0xff] %vm452_vm3, %v1346_v51  ;;  %1499 = vst.msk [vmem:[#allocation3 + $0x28] sm:$0xff] %vm452_vm3, %v1347_v52  ;;  %3533 = vmatmul.mubr.msk.f32.vlgmr.msra.gmra.mxu0 %vm452_vm3, %v1514_v56  ;;  %v950_v7 = vrot.slane %v942_v62, %v4227_v30  ;;  %v957_v8 = vrot.slane %v943_v63, %v4227_v30  ;;  %v966_v9 = vrot.slane %v958_v1, %v4227_v30 }
 0x28b   : > { %1500 = vst.msk [vmem:[#allocation3 + $0x30] sm:$0xff] %vm452_vm3, %v1348_v53  ;;  %1501 = vst.msk [vmem:[#allocation3 + $0x38] sm:$0xff] %vm452_vm3, %v1349_v54  ;;  %v1093_v3 = vrot.slane %v3383_v57, %v4227_v30  ;;  %v1109_v4 = vrot.slane %v3385_v58, %v4227_v30  ;;  %v1125_v5 = vrot.slane %v3387_v59, %v4227_v30  ;;  %3527 = vmatprep.mubr.msk.f32.mxu1 %vm3935_vm0, %v3934_v0 }
 0x28c   : > { %v1141_v6 = vrot.slane %v3389_v60, %v4227_v30  ;;  %v973_v10 = vrot.slane %v959_v2, %v4227_v30  ;;  %3535 = vmatprep.subr.mxu1 %v3934_v0  ;;  %v1006_v16 = vcombine.low %v950_v7, %v966_v9  ;;  %v1007_v17 = vcombine.high %v950_v7, %v966_v9 }
 0x28d   : > { %v1158_v11 = vcombine.low %v1093_v3, %v1109_v4  ;;  %v1159_v12 = vcombine.high %v1093_v3, %v1109_v4  ;;  %3528 = vmatmul.mubr.msk.f32.vlgmr.msra.gmra.mxu1 %vm452_vm3, %v1513_v15  ;;  %3542 = vmatprep.mubr.msk.f32.mxu0 %vm3935_vm0, %v3934_v0 }
 0x28e   : > { %v1190_v13 = vcombine.low %v1125_v5, %v1141_v6  ;;  %v1191_v14 = vcombine.high %v1125_v5, %v1141_v6  ;;  %v1022_v19 = vcombine.low %v957_v8, %v973_v10  ;;  %v1023_v20 = vcombine.high %v957_v8, %v973_v10  ;;  %3536 = vmatpush3.xpose.msk.msra.mxu1 %vm452_vm3, %v1523_v21 }
 0x28f   : > { %v1166_v22 = vrot.slane %v1158_v11, %v4229_v37  ;;  %v1173_v23 = vrot.slane %v1159_v12, %v4229_v37  ;;  %v1014_v27 = vrot.slane %v1006_v16, %v4229_v37  ;;  %v1021_v28 = vrot.slane %v1007_v17, %v4229_v37  ;;  %3537 = vmatprep.mubr.msk.f32.mxu1 %vm3935_vm0, %v3934_v0 }
 0x290   : > { %v1198_v24 = vrot.slane %v1190_v13, %v4229_v37  ;;  %v1205_v25 = vrot.slane %v1191_v14, %v4229_v37  ;;  %v1030_v26 = vrot.slane %v1022_v19, %v4229_v37  ;;  %v1037_v29 = vrot.slane %v1023_v20, %v4229_v37  ;;  %3545 = vmatprep.subr.mxu1 %v3934_v0 }
 0x291   : > { %v1524_v36 = vld [vmem:[#allocation3 + $0x20] sm:$0xff]  ;;  %v1525_v38 = vld [vmem:[#allocation3 + $0x28] sm:$0xff]  ;;  %v3398_v39 = vcombine.low %v1014_v27, %v1021_v28  ;;  %v3400_v40 = vcombine.high %v1014_v27, %v1021_v28  ;;  %3538 = vmatmul.mubr.msk.f32.vlgmr.msra.gmra.mxu1 %vm452_vm3, %v1515_v35 }
 0x292   : > { %v1210_v31 = vcombine.low %v1166_v22, %v1198_v24  ;;  %v1211_v32 = vcombine.high %v1166_v22, %v1198_v24  ;;  %v1212_v33 = vcombine.low %v1173_v23, %v1205_v25  ;;  %v1213_v34 = vcombine.high %v1173_v23, %v1205_v25  ;;  %3541 = vmatpush3.xpose.msk.msra.mxu0 %vm452_vm3, %v1524_v36  ;;  %v1526_v61 = vld [vmem:[#allocation3 + $0x30] sm:$0xff]  ;;  %v1527_v62 = vld [vmem:[#allocation3 + $0x38] sm:$0xff] }
 0x293   : > { %v3402_v41 = vcombine.low %v1030_v26, %v1037_v29  ;;  %v3404_v42 = vcombine.high %v1030_v26, %v1037_v29  ;;  %3546 = vmatpush3.xpose.msk.msra.mxu1 %vm452_vm3, %v1525_v38  ;;  %v1358_v43 = vrot.slane %v3398_v39, %v4227_v30  ;;  %v1374_v44 = vrot.slane %v3400_v40, %v4227_v30 }
 0x294   : > { %1490 = vst.msk [vmem:[#allocation2 + $0x20] sm:$0xff] %vm452_vm3, %v1210_v31  ;;  %1491 = vst.msk [vmem:[#allocation2 + $0x28] sm:$0xff] %vm452_vm3, %v1211_v32  ;;  %3547 = vmatprep.mubr.msk.f32.mxu1 %vm3935_vm0, %v3934_v0  ;;  %3550 = vmatprep.subr.mxu0 %v3934_v0 }
 0x295   : > { %1492 = vst.msk [vmem:[#allocation2 + $0x30] sm:$0xff] %vm452_vm3, %v1212_v33  ;;  %1493 = vst.msk [vmem:[#allocation2 + $0x38] sm:$0xff] %vm452_vm3, %v1213_v34  ;;  %v1390_v45 = vrot.slane %v3402_v41, %v4227_v30  ;;  %v1406_v46 = vrot.slane %v3404_v42, %v4227_v30  ;;  %v1414_v47 = vcombine.low %v1358_v43, %v1374_v44  ;;  %3555 = vmatprep.subr.mxu1 %v3934_v0 }
 0x296   : > { %v1415_v48 = vcombine.high %v1358_v43, %v1374_v44 }
 0x297   : > { %v1446_v49 = vcombine.low %v1390_v45, %v1406_v46  ;;  %v1447_v50 = vcombine.high %v1390_v45, %v1406_v46  ;;  %v1422_v51 = vrot.slane %v1414_v47, %v4229_v37 }
 0x298   : > { %v1429_v52 = vrot.slane %v1415_v48, %v4229_v37 }
 0x299   : > { %v1454_v53 = vrot.slane %v1446_v49, %v4229_v37  ;;  %v1461_v54 = vrot.slane %v1447_v50, %v4229_v37 }
 0x29b   : > { %v1478_v55 = vcombine.low %v1422_v51, %v1454_v53  ;;  %v1479_v56 = vcombine.high %v1422_v51, %v1454_v53  ;;  %v1480_v57 = vcombine.low %v1429_v52, %v1461_v54  ;;  %v1481_v58 = vcombine.high %v1429_v52, %v1461_v54  ;;  %v1516_v59 = vld [vmem:[#allocation2 + $0x20] sm:$0xff]  ;;  %v1517_v60 = vld [vmem:[#allocation2 + $0x28] sm:$0xff] }
 0x29c   : > { %3543 = vmatmul.mubr.msk.f32.vlgmr.msra.gmra.mxu0 %vm452_vm3, %v1516_v59  ;;  %3548 = vmatmul.mubr.msk.f32.vlgmr.msra.gmra.mxu1 %vm452_vm3, %v1517_v60  ;;  %v1518_v63 = vld [vmem:[#allocation2 + $0x30] sm:$0xff]  ;;  %v1519_v1 = vld [vmem:[#allocation2 + $0x38] sm:$0xff] }
 0x29d   : > { %1502 = vst.msk [vmem:[#allocation4] sm:$0xff] %vm452_vm3, %v1478_v55  ;;  %1503 = vst.msk [vmem:[#allocation4 + $0x8] sm:$0xff] %vm452_vm3, %v1479_v56  ;;  %3551 = vmatpush3.xpose.msk.msra.mxu0 %vm452_vm3, %v1526_v61  ;;  %3556 = vmatpush3.xpose.msk.msra.mxu1 %vm452_vm3, %v1527_v62 }
 0x29e   : > { %1504 = vst.msk [vmem:[#allocation4 + $0x10] sm:$0xff] %vm452_vm3, %v1480_v57  ;;  %1505 = vst.msk [vmem:[#allocation4 + $0x18] sm:$0xff] %vm452_vm3, %v1481_v58  ;;  %3552 = vmatprep.mubr.msk.f32.mxu0 %vm3935_vm0, %v3934_v0  ;;  %3557 = vmatprep.mubr.msk.f32.mxu1 %vm3935_vm0, %v3934_v0 }
 0x29f   : > { %3560 = vmatprep.subr.mxu0 %v3934_v0  ;;  %3565 = vmatprep.subr.mxu1 %v3934_v0 }
 0x2a0   : > { %3553 = vmatmul.mubr.msk.f32.vlgmr.msra.gmra.mxu0 %vm452_vm3, %v1518_v63  ;;  %3558 = vmatmul.mubr.msk.f32.vlgmr.msra.gmra.mxu1 %vm452_vm3, %v1519_v1 }
 0x2a1   : > { %3562 = vmatprep.mubr.msk.f32.mxu0 %vm3935_vm0, %v3934_v0  ;;  %3567 = vmatprep.mubr.msk.f32.mxu1 %vm3935_vm0, %v3934_v0 }
 0x2a4   : > { %v1528_v2 = vld [vmem:[#allocation4] sm:$0xff]  ;;  %v1529_v3 = vld [vmem:[#allocation4 + $0x8] sm:$0xff] }
 0x2a5   : > { %3561 = vmatpush3.msra.mxu0 %v1528_v2  ;;  %3566 = vmatpush3.msra.mxu1 %v1529_v3 }
 0x2a6   : > { %3570 = vmatprep.subr.mxu0 %v3934_v0  ;;  %3575 = vmatprep.subr.mxu1 %v3934_v0 }
 0x348   : > { %v1609_v4 = vpop.f32.mrf.mxu1 }
 0x349   : > { %v2146_v5 = vsel %vm2145_vm4, %v1609_v4, -inf }
 0x34a   : > { %v1761_v6 = vpop.f32.mrf.mxu0  ;;  %2147 = vmax.xlane.f32.xlu1 %v2146_v5  ;;  %v3524_v7 = vpop.f32.mrf.mxu1 }
 0x34b   : > { %v2152_v8 = vsel %vm2145_vm4, %v1761_v6, -inf }
 0x34c   : > { %2153 = vmax.xlane.f32.xlu0 %v2152_v8  ;;  %v3534_v9 = vpop.f32.mrf.mxu0 }
 0x34d   : > { %v1685_v10 = vpop.f32.mrf.mxu1 }
 0x34e   : > { %v2149_v11 = vsel %vm2145_vm4, %v1685_v10, -inf }
 0x34f   : > { %v3529_v12 = vpop.f32.mrf.mxu1 }
 0x350   : > { %2150 = vmax.xlane.f32.xlu0 %v2149_v11 }
 0x351   : > { %v1837_v13 = vpop.f32.mrf.mxu1 }
 0x352   : > { %v2155_v14 = vsel %vm2145_vm4, %v1837_v13, -inf }
 0x353   : > { %2156 = vmax.xlane.f32.xlu1 %v2155_v14  ;;  %v3539_v15 = vpop.f32.mrf.mxu1 }
 0x35c   : > { %v1913_v16 = vpop.f32.mrf.mxu0  ;;  %v1989_v17 = vpop.f32.mrf.mxu1 }
 0x35d   : > { %v2161_v19 = vsel %vm2145_vm4, %v1989_v17, -inf  ;;  %v2158_v20 = vsel %vm2145_vm4, %v1913_v16, -inf }
 0x35e   : > { %2162 = vmax.xlane.f32.xlu1 %v2161_v19  ;;  %v3549_v21 = vpop.f32.mrf.mxu1  ;;  %2159 = vmax.xlane.f32.xlu0 %v2158_v20  ;;  %v3544_v22 = vpop.f32.mrf.mxu0 }
 0x360   : > { %v2065_v23 = vpop.f32.mrf.mxu0  ;;  %v2141_v24 = vpop.f32.mrf.mxu1 }
 0x361   : > { %v2167_v25 = vsel %vm2145_vm4, %v2141_v24, -inf  ;;  %v2164_v27 = vsel %vm2145_vm4, %v2065_v23, -inf }
 0x362   : > { %2168 = vmax.xlane.f32.xlu1 %v2167_v25  ;;  %v3559_v28 = vpop.f32.mrf.mxu1  ;;  %2165 = vmax.xlane.f32.xlu0 %v2164_v27  ;;  %v3554_v26 = vpop.f32.mrf.mxu0 }
 0x363   : > { %v1530_v26 = vld [vmem:[#allocation4 + $0x10] sm:$0xff] }
 0x373   : > { %661 = vrot.lane.b32.xlu1 %v4206_v18, %s3957_s12  ;;  %s4548_s12 = scalar_lea.hbm %s4598_s7, %s3441_s29 }
 0x378   : > { %658 = vrot.lane.b32.xlu0 %v4206_v18, %s3958_s14  ;;  %s3241_s14 = scalar_lea.sflag [#allocation7], %s4133_s0 }
 0x3d3   : > { %v2148_v29 = vpop.xlane.xlu1 %2147 }
 0x3d4   : > { %v2170_v31 = vsub.f32 %v1609_v4, %v2148_v29 }
 0x3d5   : > { %v2154_v32 = vpop.xlane.xlu0 %2153 }
 0x3d6   : > { %v2178_v33 = vmul.f32 1.442695, %v2170_v31  ;;  %v2172_v34 = vsub.f32 %v1761_v6, %v2154_v32 }
 0x3d8   : > { %3725 = vpow2.f32 %v2178_v33  ;;  %v2182_v35 = vmul.f32 1.442695, %v2172_v34 }
 0x3d9   : > { %v2151_v36 = vpop.xlane.xlu0 %2150 }
 0x3da   : > { %3727 = vpow2.f32 %v2182_v35  ;;  %v2171_v38 = vsub.f32 %v1685_v10, %v2151_v36  ;;  %v1531_v35 = vld [vmem:[#allocation4 + $0x18] sm:$0xff] }
 0x3dc   : > { %v2180_v39 = vmul.f32 1.442695, %v2171_v38  ;;  %v2157_v40 = vpop.xlane.xlu1 %2156 }
 0x3dd   : > { %v2173_v42 = vsub.f32 %v1837_v13, %v2157_v40 }
 0x3de   : > { %3729 = vpow2.f32 %v2180_v39 }
 0x3df   : > { %v2184_v50 = vmul.f32 1.442695, %v2173_v42 }
 0x3e5   : > { %v4393_v41 = vpop.eup %3725 }
 0x3e6   : > { %v2194_v46 = vsel %vm2145_vm4, %v4393_v41, 0.0 }
 0x3e7   : > { %v2163_v43 = vpop.xlane.xlu1 %2162  ;;  %v2160_v44 = vpop.xlane.xlu0 %2159  ;;  %2195 = vadd.xlane.f32.xlu0 %v2194_v46 }
 0x3e8   : > { %v2174_v45 = vsub.f32 %v1913_v16, %v2160_v44  ;;  %v4397_v47 = vpop.eup %3727  ;;  %v2175_v48 = vsub.f32 %v1989_v17, %v2163_v43 }
 0x3e9   : > { %v2200_v55 = vsel %vm2145_vm4, %v4397_v47, 0.0 }
 0x3ea   : > { %v2186_v49 = vmul.f32 1.442695, %v2174_v45  ;;  %v2188_v57 = vmul.f32 1.442695, %v2175_v48 }
 0x3eb   : > { %v2169_v51 = vpop.xlane.xlu1 %2168  ;;  %v2166_v52 = vpop.xlane.xlu0 %2165  ;;  %2201 = vadd.xlane.f32.xlu0 %v2200_v55 }
 0x3ec   : > { %v2177_v53 = vsub.f32 %v2141_v24, %v2169_v51  ;;  %v2176_v54 = vsub.f32 %v2065_v23, %v2166_v52  ;;  %v3730_v56 = vpop.eup %3729  ;;  %3731 = vpow2.f32 %v2186_v49 }
 0x3ed   : > { %v2197_v59 = vsel %vm2145_vm4, %v3730_v56, 0.0  ;;  %3733 = vpow2.f32 %v2184_v50 }
 0x3ee   : > { %v2190_v58 = vmul.f32 1.442695, %v2176_v54  ;;  %v2192_v60 = vmul.f32 1.442695, %v2177_v53  ;;  %2198 = vadd.xlane.f32.xlu1 %v2197_v59 }
 0x3ef   : > { %v659_v8 = vpop.permute.xlu0 %658  ;;  %v662_v10 = vpop.permute.xlu1 %661 }
 0x3f0   : > { %3735 = vpow2.f32 %v2190_v58 }
 0x3f1   : > { %3737 = vpow2.f32 %v2188_v57 }
 0x3f2   : > { %3739 = vpow2.f32 %v2192_v60 }
 0x3f9   : > { %v4402_v61 = vpop.eup %3731 }
 0x3fa   : > { %v2206_v62 = vsel %vm2145_vm4, %v4402_v61, 0.0  ;;  %v4406_v63 = vpop.eup %3733 }
 0x3fb   : > { %2207 = vadd.xlane.f32.xlu1 %v2206_v62  ;;  %v2203_v3 = vsel %vm2145_vm4, %v4406_v63, 0.0 }
 0x3fd   : > { %v4408_v1 = vpop.eup %3735 }
 0x3fe   : > { %v4410_v2 = vpop.eup %3737  ;;  %v2212_v4 = vsel %vm2145_vm4, %v4408_v1, 0.0 }
 0x3ff   : > { %v4416_v5 = vpop.eup %3739  ;;  %2204 = vadd.xlane.f32.xlu1 %v2203_v3  ;;  %2213 = vadd.xlane.f32.xlu0 %v2212_v4  ;;  %v2209_v7 = vsel %vm2145_vm4, %v4410_v2, 0.0 }
 0x400   : > { %v2215_v6 = vsel %vm2145_vm4, %v4416_v5, 0.0 }
 0x403   : > { %2216 = vadd.xlane.f32.xlu1 %v2215_v6  ;;  %2210 = vadd.xlane.f32.xlu0 %v2209_v7 }
 0x414   : > { %664 = vrot.lane.b32.xlu1 %v4206_v18, %s3959_s19  ;;  %s3839_s19 = scalar_lea.vmem %s3256_s10, 128 }
 0x415   : > { %p3840_p1 = scmp.ne.s32.totalorder %s3256_s10, %s3839_s19 }
 0x417   : > { %p3841_p4 = pnand %p3840_p1, %p4092_p0 }
 0x419   : > { %667 = vrot.lane.b32.xlu0 %v4206_v18, %s3960_s30  ;;  %p3842_p8 = pneg %p3841_p4  ;;  %s3845_s30 = scalar_lea.vmem %s3844_s5, 256 }
 0x41a   : > { %p3847_p7 = scmp.lt.s32.totalorder %s3845_s30, %s3839_s19 }
 0x41c   : > { %p3848_p2 = por %p3847_p7, %p3846_p5 }
 0x41e   : > { %p3849_p6 = pnand %p3848_p2, %p3842_p8 }
 0x470   : > { %v2196_v9 = vpop.xlane.xlu0 %2195 }
 0x471   : > { %3741 = vrcp.f32 %v2196_v9 }
 0x474   : > { %v2202_v11 = vpop.xlane.xlu0 %2201 }
 0x475   : > { %3743 = vrcp.f32 %v2202_v11 }
 0x477   : > { %v2199_v12 = vpop.xlane.xlu1 %2198 }
 0x478   : > { %3745 = vrcp.f32 %v2199_v12 }
 0x47e   : > { %v3742_v13 = vpop.eup %3741 }
 0x47f   : > { %v2226_v14 = vmul.f32 %v3742_v13, %v2196_v9 }
 0x481   : > { %v2234_v15 = vsub.f32 2.0, %v2226_v14 }
 0x482   : > { %v3744_v16 = vpop.eup %3743 }
 0x483   : > { %v2242_v17 = vmul.f32 %v3742_v13, %v2234_v15  ;;  %v2228_v19 = vmul.f32 %v3744_v16, %v2202_v11 }
 0x484   : > { %v4424_v20 = vpop.xlane.xlu1 %2207 }
 0x485   : > { %v3746_v21 = vpop.eup %3745  ;;  %v2250_v22 = vmul.f32 %v4393_v41, %v2242_v17  ;;  %v2236_v23 = vsub.f32 2.0, %v2228_v19 }
 0x486   : > { %v2227_v18 = vmul.f32 %v3746_v21, %v2199_v12 }
 0x487   : > { %v2244_v25 = vmul.f32 %v3744_v16, %v2236_v23  ;;  %3563 = vmatmul.mubr.msk.f32.vlgmr.msra.gmra.mxu0 %vm2145_vm4, %v2250_v22 }
 0x488   : > { %v2235_v24 = vsub.f32 2.0, %v2227_v18  ;;  %v2205_v27 = vpop.xlane.xlu1 %2204  ;;  %v4427_v28 = vpop.xlane.xlu0 %2213  ;;  %3571 = vmatpush3.msra.mxu0 %v1530_v26  ;;  %3572 = vmatprep.mubr.msk.f32.mxu0 %vm3935_vm0, %v3934_v0 }
 0x489   : > { %3747 = vrcp.f32 %v2205_v27  ;;  %v2252_v31 = vmul.f32 %v4397_v47, %v2244_v25  ;;  %3580 = vmatprep.subr.mxu0 %v3934_v0 }
 0x48a   : > { %v2243_v29 = vmul.f32 %v3746_v21, %v2235_v24  ;;  %3749 = vrcp.f32 %v4424_v20 }
 0x48b   : > { %3573 = vmatmul.mubr.msk.f32.vlgmr.msra.gmra.mxu0 %vm2145_vm4, %v2252_v31 }
 0x48c   : > { %v2251_v32 = vmul.f32 %v3730_v56, %v2243_v29  ;;  %v4434_v33 = vpop.xlane.xlu1 %2216  ;;  %v2211_v34 = vpop.xlane.xlu0 %2210  ;;  %3582 = vmatprep.mubr.msk.f32.mxu0 %vm3935_vm0, %v3934_v0 }
 0x48d   : > { %3751 = vrcp.f32 %v2211_v34 }
 0x48e   : > { %3568 = vmatmul.mubr.msk.f32.vlgmr.msra.gmra.mxu1 %vm2145_vm4, %v2251_v32  ;;  %3753 = vrcp.f32 %v4427_v28 }
 0x48f   : > { %3576 = vmatpush3.msra.mxu1 %v1531_v35  ;;  %3577 = vmatprep.mubr.msk.f32.mxu1 %vm3935_vm0, %v3934_v0  ;;  %3755 = vrcp.f32 %v4434_v33 }
 0x490   : > { %v665_v36 = vpop.permute.xlu1 %664  ;;  %v668_v38 = vpop.permute.xlu0 %667  ;;  %3585 = vmatprep.subr.mxu1 %v3934_v0 }
 0x491   : > { %v974_v39 = vcombine.low %v659_v8, %v665_v36  ;;  %v975_v40 = vcombine.high %v659_v8, %v665_v36  ;;  %v990_v41 = vcombine.low %v662_v10, %v668_v38  ;;  %v991_v42 = vcombine.high %v662_v10, %v668_v38 }
 0x493   : > { %v982_v43 = vrot.slane %v974_v39, %v4227_v30  ;;  %v989_v44 = vrot.slane %v975_v40, %v4227_v30  ;;  %v998_v45 = vrot.slane %v990_v41, %v4227_v30  ;;  %v1005_v46 = vrot.slane %v991_v42, %v4227_v30 }
 0x495   : > { %v1038_v47 = vcombine.low %v982_v43, %v998_v45  ;;  %v1039_v48 = vcombine.high %v982_v43, %v998_v45  ;;  %v1054_v50 = vcombine.low %v989_v44, %v1005_v46  ;;  %v1055_v51 = vcombine.high %v989_v44, %v1005_v46 }
 0x496   : > { %v3748_v49 = vpop.eup %3747 }
 0x497   : > { %v2229_v52 = vmul.f32 %v3748_v49, %v2205_v27  ;;  %v1046_v53 = vrot.slane %v1038_v47, %v4229_v37  ;;  %v1053_v54 = vrot.slane %v1039_v48, %v4229_v37  ;;  %v1062_v55 = vrot.slane %v1054_v50, %v4229_v37  ;;  %v3750_v3 = vpop.eup %3749 }
 0x498   : > { %v1069_v56 = vrot.slane %v1055_v51, %v4229_v37  ;;  %v2230_v14 = vmul.f32 %v3750_v3, %v4424_v20 }
 0x499   : > { %v2237_v57 = vsub.f32 2.0, %v2229_v52  ;;  %v3399_v58 = vcombine.low %v1046_v53, %v1053_v54  ;;  %v3401_v59 = vcombine.high %v1046_v53, %v1053_v54 }
 0x49a   : > { %v3403_v60 = vcombine.low %v1062_v55, %v1069_v56  ;;  %v3405_v62 = vcombine.high %v1062_v55, %v1069_v56  ;;  %v3752_v8 = vpop.eup %3751 }
 0x49b   : > { %v2245_v4 = vmul.f32 %v3748_v49, %v2237_v57  ;;  %v1365_v6 = vrot.slane %v3399_v58, %v4227_v30  ;;  %v1381_v7 = vrot.slane %v3401_v59, %v4227_v30  ;;  %v3754_v17 = vpop.eup %3753  ;;  %v2231_v19 = vmul.f32 %v3752_v8, %v2211_v34 }
 0x49c   : > { %v1397_v9 = vrot.slane %v3403_v60, %v4227_v30  ;;  %v1413_v10 = vrot.slane %v3405_v62, %v4227_v30  ;;  %v3756_v18 = vpop.eup %3755  ;;  %v2232_v26 = vmul.f32 %v3754_v17, %v4427_v28 }
 0x49d   : > { %v2253_v11 = vmul.f32 %v4406_v63, %v2245_v4  ;;  %v1430_v12 = vcombine.low %v1365_v6, %v1381_v7  ;;  %v1431_v13 = vcombine.high %v1365_v6, %v1381_v7  ;;  %v2238_v63 = vsub.f32 2.0, %v2230_v14 }
 0x49e   : > { %v1462_v15 = vcombine.low %v1397_v9, %v1413_v10  ;;  %v1463_v16 = vcombine.high %v1397_v9, %v1413_v10  ;;  %v2233_v29 = vmul.f32 %v3756_v18, %v4434_v33  ;;  %v2239_v31 = vsub.f32 2.0, %v2231_v19 }
 0x49f   : > { %v1438_v21 = vrot.slane %v1430_v12, %v4229_v37  ;;  %v1445_v22 = vrot.slane %v1431_v13, %v4229_v37  ;;  %3578 = vmatmul.mubr.msk.f32.vlgmr.msra.gmra.mxu1 %vm2145_vm4, %v2253_v11  ;;  %v2246_v34 = vmul.f32 %v3750_v3, %v2238_v63  ;;  %v2240_v35 = vsub.f32 2.0, %v2232_v26 }
 0x4a0   : > { %v1470_v23 = vrot.slane %v1462_v15, %v4229_v37  ;;  %v1477_v24 = vrot.slane %v1463_v16, %v4229_v37  ;;  %3587 = vmatprep.mubr.msk.f32.mxu1 %vm3935_vm0, %v3934_v0  ;;  %v2241_v36 = vsub.f32 2.0, %v2233_v29  ;;  %v2247_v38 = vmul.f32 %v3752_v8, %v2239_v31 }
 0x4a1   : > { %v2254_v39 = vmul.f32 %v4402_v61, %v2246_v34  ;;  %v2248_v40 = vmul.f32 %v3754_v17, %v2240_v35  ;;  %v3157_v17 = vld [vmem:[#allocation10 + $0x18] sm:$0xff] }
 0x4a2   : > { %v1482_v20 = vcombine.low %v1438_v21, %v1470_v23  ;;  %v1483_v25 = vcombine.high %v1438_v21, %v1470_v23  ;;  %v1484_v27 = vcombine.low %v1445_v22, %v1477_v24  ;;  %v1485_v32 = vcombine.high %v1445_v22, %v1477_v24 }
 0x4a3   : > { %v2249_v28 = vmul.f32 %v3756_v18, %v2241_v36  ;;  %v2255_v33 = vmul.f32 %v4410_v2, %v2247_v38  ;;  %v2256_v61 = vmul.f32 %v4408_v1, %v2248_v40 }
 0x4a4   : > { %1506 = vst.msk [vmem:[#allocation4 + $0x20] sm:$0xff] %vm452_vm3, %v1482_v20  ;;  %1507 = vst.msk [vmem:[#allocation4 + $0x28] sm:$0xff] %vm452_vm3, %v1483_v25 }
 0x4a5   : > { %1508 = vst.msk [vmem:[#allocation4 + $0x30] sm:$0xff] %vm452_vm3, %v1484_v27  ;;  %1509 = vst.msk [vmem:[#allocation4 + $0x38] sm:$0xff] %vm452_vm3, %v1485_v32  ;;  %v2257_v45 = vmul.f32 %v4416_v5, %v2249_v28 }
 0x4ab   : > { %v1532_v41 = vld [vmem:[#allocation4 + $0x20] sm:$0xff]  ;;  %v1533_v42 = vld [vmem:[#allocation4 + $0x28] sm:$0xff] }
 0x4ac   : > { %3581 = vmatpush3.msra.mxu0 %v1532_v41  ;;  %3586 = vmatpush3.msra.mxu1 %v1533_v42  ;;  %v1534_v43 = vld [vmem:[#allocation4 + $0x30] sm:$0xff]  ;;  %v1535_v44 = vld [vmem:[#allocation4 + $0x38] sm:$0xff] }
 0x4ad   : > { %3583 = vmatmul.mubr.msk.f32.vlgmr.msra.gmra.mxu0 %vm2145_vm4, %v2254_v39  ;;  %3588 = vmatmul.mubr.msk.f32.vlgmr.msra.gmra.mxu1 %vm2145_vm4, %v2255_v33 }
 0x4ae   : > { %3590 = vmatprep.subr.mxu0 %v3934_v0  ;;  %3595 = vmatprep.subr.mxu1 %v3934_v0 }
 0x4af   : > { %3591 = vmatpush3.msra.mxu0 %v1534_v43  ;;  %3596 = vmatpush3.msra.mxu1 %v1535_v44 }
 0x4b0   : > { %3592 = vmatprep.mubr.msk.f32.mxu0 %vm3935_vm0, %v3934_v0  ;;  %3597 = vmatprep.mubr.msk.f32.mxu1 %vm3935_vm0, %v3934_v0 }
 0x4b1   : > { %3593 = vmatmul.mubr.msk.f32.vlgmr.msra.gmra.mxu0 %vm2145_vm4, %v2256_v61  ;;  %3598 = vmatmul.mubr.msk.f32.vlgmr.msra.gmra.mxu1 %vm2145_vm4, %v2257_v45 }
 0x4b2   : > { %3600 = vmatprep.subr.mxu0 %v3934_v0  ;;  %3608 = vmatprep.mubr.msk.f32.mxu0 %vm3935_vm0, %v3934_v0 }
 0x4b3   : > { %3601 = vmatpush3.msra.mxu0 %v3157_v17 }
 0x4b4   : > { %3602 = vmatprep.subr.mxu0 %v3934_v0 }
 0x547   : > { %v2327_v1 = vpop.f32.mrf.mxu0 }
 0x549   : > { %v3564_v2 = vpop.f32.mrf.mxu0 }
 0x54b   : > { %v2473_v5 = vpop.f32.mrf.mxu0 }
 0x54c   : > { %v2842_v49 = vcombine.low %v2327_v1, %v2473_v5  ;;  %v2843_v50 = vcombine.high %v2327_v1, %v2473_v5 }
 0x54d   : > { %v3574_v47 = vpop.f32.mrf.mxu0 }
 0x54e   : > { %v2400_v46 = vpop.f32.mrf.mxu1  ;;  %v2850_v55 = vrot.slane %v2842_v49, %v4227_v30  ;;  %v2857_v56 = vrot.slane %v2843_v50, %v4227_v30  ;;  %v3156_v47 = vld [vmem:[#allocation10 + $0x10] sm:$0xff] }
 0x54f   : > { %3603 = vmatpush3.msra.mxu0 %v3156_v47 }
 0x550   : > { %v3569_v48 = vpop.f32.mrf.mxu1  ;;  %3604 = vmatprep.subr.mxu0 %v3934_v0 }
 0x551   : > { %v3155_v48 = vld [vmem:[#allocation10 + $0x8] sm:$0xff] }
 0x552   : > { %3605 = vmatpush3.msra.mxu0 %v3155_v48 }
 0x553   : > { %3606 = vmatprep.subr.mxu0 %v3934_v0 }
 0x55f   : > { %v2546_v51 = vpop.f32.mrf.mxu1 }
 0x560   : > { %v2858_v52 = vcombine.low %v2400_v46, %v2546_v51  ;;  %v2859_v53 = vcombine.high %v2400_v46, %v2546_v51 }
 0x561   : > { %v3579_v54 = vpop.f32.mrf.mxu1 }
 0x562   : > { %v2866_v57 = vrot.slane %v2858_v52, %v4227_v30  ;;  %v2873_v58 = vrot.slane %v2859_v53, %v4227_v30 }
 0x564   : > { %v2906_v59 = vcombine.low %v2850_v55, %v2866_v57  ;;  %v2907_v60 = vcombine.high %v2850_v55, %v2866_v57  ;;  %v2922_v62 = vcombine.low %v2857_v56, %v2873_v58  ;;  %v2923_v3 = vcombine.high %v2857_v56, %v2873_v58 }
 0x566   : > { %v2914_v4 = vrot.slane %v2906_v59, %v4229_v37  ;;  %v2921_v6 = vrot.slane %v2907_v60, %v4229_v37  ;;  %v2930_v7 = vrot.slane %v2922_v62, %v4229_v37  ;;  %v2937_v8 = vrot.slane %v2923_v3, %v4229_v37  ;;  %v3154_v62 = vld [vmem:[#allocation10] sm:$0xff] }
 0x567   : > { %3607 = vmatpush3.msra.mxu0 %v3154_v62 }
 0x568   : > { %v3430_v9 = vcombine.low %v2914_v4, %v2921_v6  ;;  %v3432_v10 = vcombine.high %v2914_v4, %v2921_v6  ;;  %v3434_v11 = vcombine.low %v2930_v7, %v2937_v8  ;;  %v3436_v12 = vcombine.high %v2930_v7, %v2937_v8 }
 0x56a   : > { %v2986_v13 = vrot.slane %v3430_v9, %v4227_v30  ;;  %v3002_v14 = vrot.slane %v3432_v10, %v4227_v30  ;;  %v3018_v15 = vrot.slane %v3434_v11, %v4227_v30  ;;  %v3034_v16 = vrot.slane %v3436_v12, %v4227_v30 }
 0x56c   : > { %v3043_v19 = vcombine.high %v2986_v13, %v3002_v14  ;;  %v3075_v21 = vcombine.high %v3018_v15, %v3034_v16  ;;  %v3042_v22 = vcombine.low %v2986_v13, %v3002_v14  ;;  %v3074_v18 = vcombine.low %v3018_v15, %v3034_v16 }
 0x56d   : > { %v2619_v23 = vpop.f32.mrf.mxu0  ;;  %v2692_v24 = vpop.f32.mrf.mxu1 }
 0x56e   : > { %v3057_v63 = vrot.slane %v3043_v19, %v4229_v37  ;;  %v3089_v20 = vrot.slane %v3075_v21, %v4229_v37  ;;  %v4506_v25 = vrot.slane %v3042_v22, %v4229_v37  ;;  %v4509_v27 = vrot.slane %v3074_v18, %v4229_v37 }
 0x56f   : > { %v3584_v26 = vpop.f32.mrf.mxu0  ;;  %v3589_v29 = vpop.f32.mrf.mxu1 }
 0x570   : > { %v3108_v31 = vcombine.low %v3057_v63, %v3089_v20  ;;  %v3107_v32 = vcombine.high %v4506_v25, %v4509_v27  ;;  %v3106_v34 = vcombine.low %v4506_v25, %v4509_v27  ;;  %v3109_v45 = vcombine.high %v3057_v63, %v3089_v20  ;;  %v3438_v27 = vld [vmem:[%s4597_s6] ss:$0 sm:$0xff] }
 0x571   : > { %v2765_v35 = vpop.f32.mrf.mxu0  ;;  %v2838_v36 = vpop.f32.mrf.mxu1 }
 0x572   : > { %v2874_v38 = vcombine.low %v2619_v23, %v2765_v35  ;;  %v2875_v39 = vcombine.high %v2619_v23, %v2765_v35  ;;  %v2890_v40 = vcombine.low %v2692_v24, %v2838_v36  ;;  %v2891_v28 = vcombine.high %v2692_v24, %v2838_v36  ;;  %3119 = vrot.lane.b32.xlu0 %v3108_v31, %s3961_s8 }
 0x573   : > { %v3599_v33 = vpop.f32.mrf.mxu1  ;;  %3115 = vrot.lane.b32.xlu1 %v3107_v32, %s3962_s17  ;;  %v3594_v41 = vpop.f32.mrf.mxu0 }
 0x574   : > { %v2882_v42 = vrot.slane %v2874_v38, %v4227_v30  ;;  %v2889_v43 = vrot.slane %v2875_v39, %v4227_v30  ;;  %v2898_v44 = vrot.slane %v2890_v40, %v4227_v30  ;;  %v2905_v61 = vrot.slane %v2891_v28, %v4227_v30 }
 0x576   : > { %v2938_v1 = vcombine.low %v2882_v42, %v2898_v44  ;;  %v2939_v2 = vcombine.high %v2882_v42, %v2898_v44  ;;  %v2954_v5 = vcombine.low %v2889_v43, %v2905_v61  ;;  %v2955_v46 = vcombine.high %v2889_v43, %v2905_v61 }
 0x577   : > { %3123 = vrot.lane.b32.xlu1 %v3109_v45, %s3963_s18 }
 0x578   : > { %v2946_v49 = vrot.slane %v2938_v1, %v4229_v37  ;;  %v2953_v50 = vrot.slane %v2939_v2, %v4229_v37  ;;  %v2962_v51 = vrot.slane %v2954_v5, %v4229_v37  ;;  %v2969_v52 = vrot.slane %v2955_v46, %v4229_v37 }
 0x57a   : > { %v3431_v53 = vcombine.low %v2946_v49, %v2953_v50  ;;  %v3433_v54 = vcombine.high %v2946_v49, %v2953_v50  ;;  %v3435_v55 = vcombine.low %v2962_v51, %v2969_v52  ;;  %v3437_v56 = vcombine.high %v2962_v51, %v2969_v52 }
 0x57c   : > { %v2993_v57 = vrot.slane %v3431_v53, %v4227_v30  ;;  %v3009_v58 = vrot.slane %v3433_v54, %v4227_v30  ;;  %v3025_v59 = vrot.slane %v3435_v55, %v4227_v30  ;;  %v3041_v60 = vrot.slane %v3437_v56, %v4227_v30 }
 0x57e   : > { %v3058_v3 = vcombine.low %v2993_v57, %v3009_v58  ;;  %v3090_v4 = vcombine.low %v3025_v59, %v3041_v60  ;;  %v3059_v6 = vcombine.high %v2993_v57, %v3009_v58  ;;  %v3091_v7 = vcombine.high %v3025_v59, %v3041_v60 }
 0x580   : > { %v3066_v8 = vrot.slane %v3058_v3, %v4229_v37  ;;  %v3098_v9 = vrot.slane %v3090_v4, %v4229_v37  ;;  %v3073_v11 = vrot.slane %v3059_v6, %v4229_v37  ;;  %v3105_v12 = vrot.slane %v3091_v7, %v4229_v37 }
 0x582   : > { %v3111_v10 = vcombine.high %v3066_v8, %v3098_v9  ;;  %v3110_v0 = vcombine.low %v3066_v8, %v3098_v9  ;;  %v3113_v30 = vcombine.high %v3073_v11, %v3105_v12  ;;  %v3112_v13 = vcombine.low %v3073_v11, %v3105_v12 }
 0x584   : > { %3131 = vrot.lane.b32.xlu1 %v3111_v10, %s3964_s20  ;;  %3127 = vrot.lane.b32.xlu0 %v3110_v0, %s3965_s13 }
 0x588   : > { %3139 = vrot.lane.b32.xlu1 %v3113_v30, %s3966_s21  ;;  %3135 = vrot.lane.b32.xlu0 %v3112_v13, %s3967_s16 }
 0x5e4   : > { %v3120_v15 = vpop.permute.xlu0 %3119 }
 0x5e5   : > { %v3116_v14 = vpop.permute.xlu1 %3115 }
 0x5e6   : > { %v3142_v16 = vsel %vm452_vm3, %v3106_v34, %v3116_v14 }
 0x5e7   : > { %v3143_v37 = vsel %vm2145_vm4, %v3142_v16, %v3120_v15 }
 0x5e9   : > { %v3124_v17 = vpop.permute.xlu1 %3123 }
 0x5ea   : > { %v3145_v19 = vsel %vm3144_vm5, %v3143_v37, %v3124_v17 }
 0x5f6   : > { %v3132_v21 = vpop.permute.xlu1 %3131  ;;  %v3128_v22 = vpop.permute.xlu0 %3127 }
 0x5f7   : > { %v3147_v18 = vsel %vm3146_vm6, %v3145_v19, %v3128_v22 }
 0x5f8   : > { %v3149_v24 = vsel %vm3148_vm7, %v3147_v18, %v3132_v21 }
 0x5fa   : > { %v3140_v23 = vpop.permute.xlu1 %3139  ;;  %v3136_v63 = vpop.permute.xlu0 %3135 }
 0x5fb   : > { %v3151_v20 = vsel %vm3150_vm8, %v3149_v24, %v3136_v63 }
 0x5fc   : > { %v3153_v25 = vsel %vm3152_vm9, %v3151_v20, %v3140_v23 }
 0x5fd   : > { %3609 = vmatmul.mubr.msk.f32.vlgmr.msra.gmra.mxu0 %vm366_vm1, %v3153_v25 }
 0x6bd   : > { %v3235_v26 = vpop.f32.mrf.mxu0 }
 0x6be   : > { %v3236_v29 = vadd.f32 %v3438_v27, %v3235_v26 }
 0x6bf   : > { %v3610_v31 = vpop.f32.mrf.mxu0 }
 0x6c0   : > { %3239 = vst.msk [vmem:[%s355_s26] sm:$0xff] %vm366_vm1, %v3236_v29 }
 0x6c1   : > { %3852 = shalt.err (!%p3849_p6)
}
 0x6c2   : > { %s3853_s8 = scalar_lea.hbm %s4548_s12, 128  ;;  %s3857_s18 = scalar_lea.hbm %s4598_s7, 256 }
 0x6c3   : > { %p3854_p9 = scmp.ne.s32.totalorder %s4548_s12, %s3853_s8  ;;  %p3858_p11 = scmp.lt.s32.totalorder %s4548_s12, %s4598_s7 }
 0x6c4   : > { %p3859_p3 = scmp.lt.s32.totalorder %s3857_s18, %s3853_s8 }
 0x6c5   : > { %p3855_p12 = pnand %p3854_p9, %p4092_p0 }
 0x6c6   : > { %p3860_p1 = por %p3859_p3, %p3858_p11 }
 0x6c7   : > { %p3856_p13 = pneg %p3855_p12 }
 0x6c9   : > { %p3861_p4 = pnand %p3860_p1, %p3856_p13 }
 0x6cb   : > { %3864 = shalt.err (!%p3861_p4)
}
 0x6cc   : > { %3619 = dma.vmem_to_hbm [thread:$0]  (%p4092_p0), %s3256_s10, 128, %s4548_s12, %s3241_s14  }
 0x6cd PF: > { %s4621_s21 = sld [smem:[#allocation18_spill]]  ;;  %s3267_s22 = sand.u32 1, %s3907_s24  }
 0x6ce   : > { %s4622_s16 = sld [smem:[#allocation17_spill]]  ;;  %s3268_s15 = scalar_lea.sflag [#allocation7], %s3267_s22 }
 0x6d3   : > { %p4623_p8 = scmp.ne.s32.totalorder %s4621_s21, 0 }
 0x6d5   : > { %p3633_p5 = pnand %p3369_p10, %p4623_p8 }
 0x6d7   : > { %p3634_p7 = pneg %p3633_p5 }
 0x6d9   : > { %3902 = dma.done.wait (%p3634_p7), %s3268_s15, 128  }
 0x6da   : > { %3904 = vsyncadd (%p3634_p7), %s3268_s15, 4294967168  ;;  %s26_s29 = sadd.s32 1, %s4622_s16   ;;  %s4624_s26 = sld [smem:[#allocation16_spill]] }
 0x6db   : > { %p23_p2 = scmp.ge.s32.totalorder %s26_s29, 4   ;;  %s4625_s23 = sld [smem:[#allocation20_spill]] }
 0x6dc   : > { %s4626_s10 = sld [smem:[#allocation19_spill]]  ;;  %s4627_s24 = smov %s3911_s25 }
 0x6dd   : > { %s4630_s27 = smov %s3923_s28 }
 0x6de   :  { %25 = sbr.rel (!%p23_p2) target bundleno = 11 (0xb), region = 115 }
 0x6e0   : > { %s4628_s25 = smov %s4624_s26 }
 0x6e1   : > { %s4629_s26 = smov %s4625_s23 }
 0x6e2   : > { %s4631_s28 = smov %s4626_s10 }
 0x6e3   :  { %3273 = vsyncpa [#allocation6], 1 }
 0x6e4   :  { %3275 = vsyncpa [#allocation6 + $0x1], 1 }
 0x6e5   :  { %3276 = vsyncpa [#allocation9], 1 }
 0x6e6   :  { %3278 = vsyncpa [#allocation9 + $0x1], 1 }
 0x6e7   :  { %3279 = vsyncpa [#allocation7], 1 }
 0x6e8   :  { %3281 = vsyncpa [#allocation7 + $0x1], 1 }

</bundles_post_ra>
